<compile_context>
chip_gen: v6e
topology: v6e:2x2x1
jax: 0.10.0
libtpu: 0.0.40
codegen_flags: <defaults>
</compile_context>

<pallas_src>
import functools

import jax
import jax.numpy as jnp
import numpy as np
from jax.experimental import pallas as pl
from jax.experimental.pallas import tpu as pltpu


def _round_up(x, m):
    return ((x + m - 1) // m) * m


def _cdiv(a, b):
    return -(-a // b)


# ---------------------------------------------------------------------------
# Fused recurrent kernel: one grid step = `tb` time steps for one batch block.
# Both the input projection and the recurrence run here; h/c persist in VMEM
# scratch across time chunks and stay in vregs inside the chunk (static unroll).
# ---------------------------------------------------------------------------
def lstm_fused_kernel(blkmax_ref, lens_ref, x_ref, wih_ref, whh_ref, b_ref,
                      h0_ref, c0_ref, out_ref, h_sc, c_sc, *, tb, hp):
    bi = pl.program_id(0)                      # batch-block index (parallel)
    ti = pl.program_id(1)                      # time-chunk index (sequential)
    t0 = ti * tb

    @pl.when(ti == 0)
    def _():
        h_sc[...] = h0_ref[...]
        c_sc[...] = c0_ref[...]

    # Longest sequence in this batch block (scalar-prefetched, lives in SMEM).
    blk_max_len = blkmax_ref[bi]

    @pl.when(t0 >= blk_max_len)
    def _():
        # Whole chunk is past every sequence in this batch block: skip all the
        # matmuls / EUP work and emit only the zero padding pad_packed_sequence
        # requires.  State is frozen for every row, so h_sc/c_sc are untouched.
        out_ref[...] = jnp.zeros_like(out_ref)

    @pl.when(t0 < blk_max_len)
    def _():
        wih = wih_ref[...]                     # (inp, 4*Hp) bf16, hoisted
        whh = whh_ref[...]                     # (Hp,  4*Hp) bf16, hoisted
        bias = b_ref[...]                      # (1, 4*Hp) f32
        lens = lens_ref[...]                   # (BB, 1) int32

        h = h_sc[...]                          # (BB, Hp) f32
        c = c_sc[...]
        for s in range(tb):                    # static unroll over the chunk
            # Fused input projection + recurrence, f32 accumulation on the MXU.
            gates = (jnp.dot(x_ref[s], wih, preferred_element_type=jnp.float32)
                     + bias
                     + jnp.dot(h.astype(jnp.bfloat16), whh,
                               preferred_element_type=jnp.float32))
            # Gate slabs are 128-lane aligned (hp is a multiple of 128).
            i_g = jax.nn.sigmoid(gates[:, 0 * hp:1 * hp])
            f_g = jax.nn.sigmoid(gates[:, 1 * hp:2 * hp])
            g_g = jnp.tanh(gates[:, 2 * hp:3 * hp])
            o_g = jax.nn.sigmoid(gates[:, 3 * hp:4 * hp])
            c_new = f_g * c + i_g * g_g
            h_new = o_g * jnp.tanh(c_new)

            valid = lens > (t0 + s)            # (BB, 1) bool
            h = jnp.where(valid, h_new, h)
            c = jnp.where(valid, c_new, c)
            # Lane-dense (BB, Hp) store per step — large and unmasked.
            out_ref[s] = jnp.where(valid, h_new, 0.0).astype(out_ref.dtype)
        h_sc[...] = h
        c_sc[...] = c


def lstm_forward_pallas(x_pad, lens, w_ih_t_pad, w_hh_t_pad, b_pad,
                        h0, c0, nhid, *, time_chunk=16, batch_block=128,
                        out_dtype=jnp.float32):
    """x_pad: (T, B, inp) f32; lens: (B,) int32.  Returns (T, B, nhid) f32."""
    T, B, inp = x_pad.shape
    hp = w_hh_t_pad.shape[0]                   # padded hidden size (mult of 128)

    # --- tile sizing --------------------------------------------------------
    tb = max(1, min(time_chunk, T))
    B8 = _round_up(B, 8)
    bb = min(_round_up(batch_block, 8), B8)
    # Keep >=2 blocks on the 'parallel' batch axis when the batch allows so
    # megacore sharding (v7x: 2 TensorCores) actually has work to split.
    if _cdiv(B8, bb) < 2 and B8 >= 16:
        bb = _round_up(B8 // 2, 8)
    T_pad = _round_up(T, tb)
    B_pad = _round_up(B, bb)
    nbb = B_pad // bb

    # --- pad inputs / state / lengths (padded rows have length 0) ------------
    xp = jnp.zeros((T_pad, B_pad, inp), jnp.bfloat16)
    xp = xp.at[:T, :B, :].set(x_pad.astype(jnp.bfloat16))
    lens_p = jnp.zeros((B_pad, 1), jnp.int32).at[:B, 0].set(lens.astype(jnp.int32))
    h0p = jnp.zeros((B_pad, hp), jnp.float32).at[:B, :nhid].set(h0)
    c0p = jnp.zeros((B_pad, hp), jnp.float32).at[:B, :nhid].set(c0)
    # Per batch-block max length, scalar-prefetched so dead chunks are skipped.
    blk_max = lens_p.reshape(nbb, bb).max(axis=1).astype(jnp.int32)

    # --- explicit VMEM budget (leave headroom; clamp to sane bounds) ---------
    out_isize = jnp.dtype(out_dtype).itemsize
    est_bytes = (
        2 * tb * bb * inp * 2          # x chunk (bf16), double-buffered
        + 2 * bb * 1 * 4               # lens block
        + 1 * inp * 4 * hp * 2         # W_ih^T (bf16), Buffered(1)
        + 1 * hp * 4 * hp * 2          # W_hh^T (bf16), Buffered(1)
        + 1 * 1 * 4 * hp * 4           # bias (f32), Buffered(1)
        + 2 * 2 * bb * hp * 4          # h0 / c0 blocks
        + 2 * tb * bb * hp * out_isize # output chunk, double-buffered
        + 2 * bb * hp * 4              # h_sc / c_sc scratch
        + 4 * bb * 4 * hp * 4          # headroom for per-step gate temporaries
    )
    vmem_limit = int(min(max(2 * est_bytes, 32 * 1024 * 1024),
                         128 * 1024 * 1024))

    out_full = pl.pallas_call(
        functools.partial(lstm_fused_kernel, tb=tb, hp=hp),
        out_shape=jax.ShapeDtypeStruct((T_pad, B_pad, hp), out_dtype),
        grid_spec=pltpu.PrefetchScalarGridSpec(
            num_scalar_prefetch=1,
            grid=(nbb, T_pad // tb),
            in_specs=[
                pl.BlockSpec((bb, 1), lambda bi, ti, bm: (bi, 0)),            # lens
                pl.BlockSpec((tb, bb, inp), lambda bi, ti, bm: (ti, bi, 0)),  # x (bf16)
                # Time-invariant operands: single-buffered (halves weight VMEM
                # residency at production hidden sizes, critical on v7x).
                pl.BlockSpec((inp, 4 * hp), lambda bi, ti, bm: (0, 0),
                             pipeline_mode=pl.Buffered(1)),                   # W_ih^T
                pl.BlockSpec((hp, 4 * hp), lambda bi, ti, bm: (0, 0),
                             pipeline_mode=pl.Buffered(1)),                   # W_hh^T
                pl.BlockSpec((1, 4 * hp), lambda bi, ti, bm: (0, 0),
                             pipeline_mode=pl.Buffered(1)),                   # bias
                pl.BlockSpec((bb, hp), lambda bi, ti, bm: (bi, 0)),           # h0
                pl.BlockSpec((bb, hp), lambda bi, ti, bm: (bi, 0)),           # c0
            ],
            out_specs=pl.BlockSpec((tb, bb, hp), lambda bi, ti, bm: (ti, bi, 0)),
            scratch_shapes=[pltpu.VMEM((bb, hp), jnp.float32),
                            pltpu.VMEM((bb, hp), jnp.float32)],
        ),
        compiler_params=pltpu.CompilerParams(
            dimension_semantics=("parallel", "arbitrary"),
            vmem_limit_bytes=vmem_limit),
    )(blk_max, lens_p, xp, w_ih_t_pad, w_hh_t_pad, b_pad, h0p, c0p)

    # TODO(synk): set out_dtype=jnp.bfloat16 if downstream consumers accept it
    # (halves the HBM writeback and the output VMEM blocks; state stays f32).
    return out_full[:T, :B, :nhid].astype(jnp.float32)


class RNNPallas:
    """Mirror of the PyTorch RNN module's forward (single-layer LSTM)."""

    def __init__(self, inp_size, nhid, nlayer=1, dropout=0.1, key=None):
        assert nlayer == 1, "reference forward only exercises a 1-layer LSTM"
        # TODO(synk): nn.LSTM dropout applies only between layers; nlayer=1 => no-op.
        self.inp_size = inp_size
        self.nhid = nhid
        self.hp = _round_up(nhid, 128)         # lane-dense padded hidden size
        key = key if key is not None else jax.random.PRNGKey(0)
        k1, k2, k3, k4 = jax.random.split(key, 4)
        bound = 1.0 / np.sqrt(nhid)
        # PyTorch LSTM param shapes: W_ih (4H, I), W_hh (4H, H), b_ih/b_hh (4H,)
        w_ih = np.asarray(jax.random.uniform(k1, (4 * nhid, inp_size),
                                             jnp.float32, -bound, bound))
        w_hh = np.asarray(jax.random.uniform(k2, (4 * nhid, nhid),
                                             jnp.float32, -bound, bound))
        b_ih = np.asarray(jax.random.uniform(k3, (4 * nhid,), jnp.float32, -bound, bound))
        b_hh = np.asarray(jax.random.uniform(k4, (4 * nhid,), jnp.float32, -bound, bound))
        b = b_ih + b_hh

        H, Hp, I = nhid, self.hp, inp_size
        # Padded, gate-slab layout: columns [k*Hp : k*Hp+H] hold gate k (i,f,g,o).
        w_ih_t_pad = np.zeros((I, 4 * Hp), np.float32)
        w_hh_t_pad = np.zeros((Hp, 4 * Hp), np.float32)
        b_pad = np.zeros((1, 4 * Hp), np.float32)
        for k in range(4):
            w_ih_t_pad[:, k * Hp:k * Hp + H] = w_ih[k * H:(k + 1) * H, :].T
            w_hh_t_pad[:H, k * Hp:k * Hp + H] = w_hh[k * H:(k + 1) * H, :].T
            b_pad[0, k * Hp:k * Hp + H] = b[k * H:(k + 1) * H]
        # bf16 weights (native MXU path, half the VMEM/DMA), f32 bias & accumulation.
        self.w_ih_t_pad = jnp.asarray(w_ih_t_pad, jnp.bfloat16)
        self.w_hh_t_pad = jnp.asarray(w_hh_t_pad, jnp.bfloat16)
        self.b_pad = jnp.asarray(b_pad, jnp.float32)
        # Unpadded copies for the pure-JAX reference check.
        self.w_ih_t = jnp.asarray(w_ih.T, jnp.bfloat16)           # (I, 4H)
        self.w_hh_t = jnp.asarray(w_hh.T, jnp.bfloat16)           # (H, 4H)
        self.bias = jnp.asarray(b.reshape(1, 4 * nhid), jnp.float32)

    def forward(self, seq_list, h0=None, c0=None):
        """seq_list: list of (len_i, inp_size) arrays (like pack_sequence input).
        Returns (seq_unpacked (T_max, B, nhid), lens_unpacked (B,) int32)."""
        B = len(seq_list)
        lens = jnp.asarray([s.shape[0] for s in seq_list], dtype=jnp.int32)
        T = int(max(int(s.shape[0]) for s in seq_list))
        x_np = np.zeros((T, B, self.inp_size), np.float32)
        for b_idx, s in enumerate(seq_list):
            x_np[: s.shape[0], b_idx, :] = np.asarray(s, np.float32)
        x_pad = jnp.asarray(x_np)
        if h0 is None:
            h0 = jnp.zeros((B, self.nhid), jnp.float32)
        if c0 is None:
            c0 = jnp.zeros((B, self.nhid), jnp.float32)
        out = lstm_forward_pallas(x_pad, lens, self.w_ih_t_pad, self.w_hh_t_pad,
                                  self.b_pad, h0, c0, self.nhid)
        # TODO(synk): nn.LSTM also returns (h_n, c_n); the spec's forward only
        # uses (seq_unpacked, lens_unpacked), so final states are not returned.
        return out, lens


def _reference_lstm(x_pad, lens, w_ih_t, w_hh_t, b, h0, c0, nhid):
    """Pure-JAX reference (lax.scan) with matching bf16 matmul inputs."""
    def step(carry, inputs):
        h, c = carry
        x_t, t = inputs
        gates = (jnp.dot(x_t.astype(jnp.bfloat16), w_ih_t,
                         preferred_element_type=jnp.float32)
                 + jnp.dot(h.astype(jnp.bfloat16), w_hh_t,
                           preferred_element_type=jnp.float32)
                 + b)
        i = jax.nn.sigmoid(gates[:, 0 * nhid:1 * nhid])
        f = jax.nn.sigmoid(gates[:, 1 * nhid:2 * nhid])
        g = jnp.tanh(gates[:, 2 * nhid:3 * nhid])
        o = jax.nn.sigmoid(gates[:, 3 * nhid:4 * nhid])
        c_new = f * c + i * g
        h_new = o * jnp.tanh(c_new)
        valid = (lens > t)[:, None]
        h2 = jnp.where(valid, h_new, h)
        c2 = jnp.where(valid, c_new, c)
        y = jnp.where(valid, h_new, 0.0)
        return (h2, c2), y

    T = x_pad.shape[0]
    (_, _), ys = jax.lax.scan(step, (h0, c0), (x_pad, jnp.arange(T)))
    return ys


if __name__ == "__main__":
    key = jax.random.PRNGKey(0)
    inp_size, nhid = 16, 32
    model = RNNPallas(inp_size, nhid, nlayer=1, dropout=0.1, key=key)

    # Variable-length sequences (like the list passed to pack_sequence).
    k1, k2, k3 = jax.random.split(jax.random.PRNGKey(0), 3)
    seqs = [
        jax.random.normal(k1, (8, inp_size), jnp.float32),
        jax.random.normal(k2, (5, inp_size), jnp.float32),
        jax.random.normal(k3, (3, inp_size), jnp.float32),
    ]

    seq_unpacked, lens_unpacked = model.forward(seqs)
    seq_unpacked = jax.block_until_ready(seq_unpacked)

    # Correctness check against a pure-JAX reference.
    B = len(seqs)
    T = int(lens_unpacked.max())
    x_pad = jnp.zeros((T, B, inp_size), jnp.float32)
    for b_idx, s in enumerate(seqs):
        x_pad = x_pad.at[: s.shape[0], b_idx, :].set(s)
    ref = _reference_lstm(x_pad, lens_unpacked, model.w_ih_t, model.w_hh_t,
                          model.bias, jnp.zeros((B, nhid)), jnp.zeros((B, nhid)),
                          nhid)
    np.testing.assert_allclose(np.asarray(seq_unpacked), np.asarray(ref),
                               rtol=1e-3, atol=1e-3)
    assert seq_unpacked.shape == (8, 3, nhid)
    assert tuple(np.asarray(lens_unpacked)) == (8, 5, 3)
    print("KERNEL_OK")
</pallas_src>

<mosaic_0001>
module attributes {stable_mosaic.version = 11 : i64} {
  func.func @lstm_fused_kernel(%arg0: i32, %arg1: i32, %arg2: memref<1xi32, #tpu.memory_space<smem>>, %arg3: memref<8x1xi32, #tpu.memory_space<vmem>>, %arg4: memref<8x8x16xbf16, #tpu.memory_space<vmem>>, %arg5: memref<16x512xbf16, #tpu.memory_space<vmem>>, %arg6: memref<128x512xbf16, #tpu.memory_space<vmem>>, %arg7: memref<1x512xf32, #tpu.memory_space<vmem>>, %arg8: memref<8x128xf32, #tpu.memory_space<vmem>>, %arg9: memref<8x128xf32, #tpu.memory_space<vmem>>, %arg10: memref<8x8x128xf32, #tpu.memory_space<vmem>>, %arg11: memref<8x128xf32, #tpu.memory_space<vmem>>, %arg12: memref<8x128xf32, #tpu.memory_space<vmem>>) attributes {dimension_semantics = [#tpu.dimension_semantics<parallel>, #tpu.dimension_semantics<arbitrary>], iteration_bounds = array<i64: 1, 1>, scalar_prefetch = 1 : i64, scratch_operands = 2 : i64, tpu.core_type = #tpu.core_type<tc>, window_params = [{transform_indices = @transform_0, window_bounds = array<i64: 8, 1>}, {transform_indices = @transform_1, window_bounds = array<i64: 8, 8, 16>}, {pipeline_mode = #tpu.pipeline_mode<synchronous>, transform_indices = @transform_2, window_bounds = array<i64: 16, 512>}, {pipeline_mode = #tpu.pipeline_mode<synchronous>, transform_indices = @transform_3, window_bounds = array<i64: 128, 512>}, {pipeline_mode = #tpu.pipeline_mode<synchronous>, transform_indices = @transform_4, window_bounds = array<i64: 1, 512>}, {transform_indices = @transform_5, window_bounds = array<i64: 8, 128>}, {transform_indices = @transform_6, window_bounds = array<i64: 8, 128>}, {transform_indices = @transform_7, window_bounds = array<i64: 8, 8, 128>}]} {
    %c8_i32 = arith.constant 8 : i32
    %0 = arith.muli %arg1, %c8_i32 : i32
    %c0_i32 = arith.constant 0 : i32
    %1 = arith.cmpi eq, %arg1, %c0_i32 : i32
    %2 = arith.extui %1 : i1 to i32
    %c0_i32_0 = arith.constant 0 : i32
    %3 = arith.cmpi ne, %2, %c0_i32_0 : i32
    scf.if %3 {
      %c0 = arith.constant 0 : index
      %c0_3 = arith.constant 0 : index
      %12 = vector.load %arg8[%c0, %c0_3] : memref<8x128xf32, #tpu.memory_space<vmem>>, vector<8x128xf32>
      %c0_4 = arith.constant 0 : index
      %c0_5 = arith.constant 0 : index
      %13 = vector.load %arg11[%c0_4, %c0_5] : memref<8x128xf32, #tpu.memory_space<vmem>>, vector<8x128xf32>
      tpu.vector_store %arg11[%c0_4, %c0_5], %12 {strides = array<i32>} : memref<8x128xf32, #tpu.memory_space<vmem>>, vector<8x128xf32>,
      %c0_6 = arith.constant 0 : index
      %c0_7 = arith.constant 0 : index
      %14 = vector.load %arg9[%c0_6, %c0_7] : memref<8x128xf32, #tpu.memory_space<vmem>>, vector<8x128xf32>
      %c0_8 = arith.constant 0 : index
      %c0_9 = arith.constant 0 : index
      %15 = vector.load %arg12[%c0_8, %c0_9] : memref<8x128xf32, #tpu.memory_space<vmem>>, vector<8x128xf32>
      tpu.vector_store %arg12[%c0_8, %c0_9], %14 {strides = array<i32>} : memref<8x128xf32, #tpu.memory_space<vmem>>, vector<8x128xf32>,
    } else {
    }
    %4 = arith.index_cast %arg0 : i32 to index
    %5 = memref.load %arg2[%4] : memref<1xi32, #tpu.memory_space<smem>>
    %6 = arith.cmpi sge, %0, %5 : i32
    %7 = arith.extui %6 : i1 to i32
    %c0_i32_1 = arith.constant 0 : i32
    %8 = arith.cmpi ne, %7, %c0_i32_1 : i32
    scf.if %8 {
      %cst = arith.constant 0.000000e+00 : f32
      %12 = vector.broadcast %cst : f32 to vector<8x8x128xf32>
      %c0 = arith.constant 0 : index
      %c0_3 = arith.constant 0 : index
      %c0_4 = arith.constant 0 : index
      %13 = vector.load %arg10[%c0, %c0_3, %c0_4] : memref<8x8x128xf32, #tpu.memory_space<vmem>>, vector<8x8x128xf32>
      tpu.vector_store %arg10[%c0, %c0_3, %c0_4], %12 {strides = array<i32>} : memref<8x8x128xf32, #tpu.memory_space<vmem>>, vector<8x8x128xf32>,
    } else {
    }
    %9 = arith.cmpi slt, %0, %5 : i32
    %10 = arith.extui %9 : i1 to i32
    %c0_i32_2 = arith.constant 0 : i32
    %11 = arith.cmpi ne, %10, %c0_i32_2 : i32
    scf.if %11 {
      %c0 = arith.constant 0 : index
      %c0_3 = arith.constant 0 : index
      %12 = vector.load %arg5[%c0, %c0_3] : memref<16x512xbf16, #tpu.memory_space<vmem>>, vector<16x512xbf16>
      %c0_4 = arith.constant 0 : index
      %c0_5 = arith.constant 0 : index
      %13 = vector.load %arg6[%c0_4, %c0_5] : memref<128x512xbf16, #tpu.memory_space<vmem>>, vector<128x512xbf16>
      %c0_6 = arith.constant 0 : index
      %c0_7 = arith.constant 0 : index
      %14 = vector.load %arg7[%c0_6, %c0_7] : memref<1x512xf32, #tpu.memory_space<vmem>>, vector<1x512xf32>
      %c0_8 = arith.constant 0 : index
      %c0_9 = arith.constant 0 : index
      %15 = vector.load %arg3[%c0_8, %c0_9] : memref<8x1xi32, #tpu.memory_space<vmem>>, vector<8x1xi32>
      %c0_10 = arith.constant 0 : index
      %c0_11 = arith.constant 0 : index
      %16 = vector.load %arg11[%c0_10, %c0_11] : memref<8x128xf32, #tpu.memory_space<vmem>>, vector<8x128xf32>
      %c0_12 = arith.constant 0 : index
      %c0_13 = arith.constant 0 : index
      %17 = vector.load %arg12[%c0_12, %c0_13] : memref<8x128xf32, #tpu.memory_space<vmem>>, vector<8x128xf32>
      %c0_14 = arith.constant 0 : index
      %c0_15 = arith.constant 0 : index
      %c0_16 = arith.constant 0 : index
      %18 = vector.load %arg4[%c0_14, %c0_15, %c0_16] : memref<8x8x16xbf16, #tpu.memory_space<vmem>>, vector<1x8x16xbf16>
      %19 = vector.shape_cast %18 : vector<1x8x16xbf16> to vector<8x16xbf16>
      %cst = arith.constant dense<0.000000e+00> : vector<8x512xf32>
      %20 = tpu.matmul %19, %12, %cst {dimension_numbers = #tpu.dot_dimension_numbers<[1], [0], [0], [1], [0, 0, 1, 1], [], []>} : vector<8x16xbf16>, vector<16x512xbf16>, vector<8x512xf32> -> vector<8x512xf32>
      %21 = vector.broadcast %14 : vector<1x512xf32> to vector<8x512xf32>
      %22 = arith.addf %20, %21 : vector<8x512xf32>
      %23 = arith.truncf %16 : vector<8x128xf32> to vector<8x128xbf16>
      %cst_17 = arith.constant dense<0.000000e+00> : vector<8x512xf32>
      %24 = tpu.matmul %23, %13, %cst_17 {dimension_numbers = #tpu.dot_dimension_numbers<[1], [0], [0], [1], [0, 0, 1, 1], [], []>} : vector<8x128xbf16>, vector<128x512xbf16>, vector<8x512xf32> -> vector<8x512xf32>
      %25 = arith.addf %22, %24 : vector<8x512xf32>
      %26 = vector.extract_strided_slice %25 {offsets = [0, 0], sizes = [8, 128], strides = [1, 1]} : vector<8x512xf32> to vector<8x128xf32>
      %27 = arith.negf %26 : vector<8x128xf32>
      %28 = math.exp %27 : vector<8x128xf32>
      %cst_18 = arith.constant 1.000000e+00 : f32
      %29 = vector.broadcast %cst_18 : f32 to vector<8x128xf32>
      %30 = arith.addf %29, %28 : vector<8x128xf32>
      %31 = arith.divf %29, %30 : vector<8x128xf32>
      %32 = vector.extract_strided_slice %25 {offsets = [0, 128], sizes = [8, 128], strides = [1, 1]} : vector<8x512xf32> to vector<8x128xf32>
      %33 = arith.negf %32 : vector<8x128xf32>
      %34 = math.exp %33 : vector<8x128xf32>
      %cst_19 = arith.constant 1.000000e+00 : f32
      %35 = vector.broadcast %cst_19 : f32 to vector<8x128xf32>
      %36 = arith.addf %35, %34 : vector<8x128xf32>
      %37 = arith.divf %35, %36 : vector<8x128xf32>
      %38 = vector.extract_strided_slice %25 {offsets = [0, 256], sizes = [8, 128], strides = [1, 1]} : vector<8x512xf32> to vector<8x128xf32>
      %39 = math.tanh %38 : vector<8x128xf32>
      %40 = vector.extract_strided_slice %25 {offsets = [0, 384], sizes = [8, 128], strides = [1, 1]} : vector<8x512xf32> to vector<8x128xf32>
      %41 = arith.negf %40 : vector<8x128xf32>
      %42 = math.exp %41 : vector<8x128xf32>
      %cst_20 = arith.constant 1.000000e+00 : f32
      %43 = vector.broadcast %cst_20 : f32 to vector<8x128xf32>
      %44 = arith.addf %43, %42 : vector<8x128xf32>
      %45 = arith.divf %43, %44 : vector<8x128xf32>
      %46 = arith.mulf %37, %17 : vector<8x128xf32>
      %47 = arith.mulf %31, %39 : vector<8x128xf32>
      %48 = arith.addf %46, %47 : vector<8x128xf32>
      %49 = math.tanh %48 : vector<8x128xf32>
      %50 = arith.mulf %45, %49 : vector<8x128xf32>
      %c0_i32_21 = arith.constant 0 : i32
      %51 = arith.addi %0, %c0_i32_21 : i32
      %52 = vector.broadcast %51 : i32 to vector<8x1xi32>
      %53 = arith.cmpi sgt, %15, %52 : vector<8x1xi32>
      %54 = vector.shape_cast %53 : vector<8x1xi1> to vector<8x1xi1>
      %55 = vector.broadcast %54 : vector<8x1xi1> to vector<8x128xi1>
      %56 = arith.select %55, %50, %16 : vector<8x128xi1>, vector<8x128xf32>
      %57 = vector.shape_cast %53 : vector<8x1xi1> to vector<8x1xi1>
      %58 = vector.broadcast %57 : vector<8x1xi1> to vector<8x128xi1>
      %59 = arith.select %58, %48, %17 : vector<8x128xi1>, vector<8x128xf32>
      %cst_22 = arith.constant 0.000000e+00 : f32
      %60 = vector.shape_cast %53 : vector<8x1xi1> to vector<8x1xi1>
      %61 = vector.broadcast %60 : vector<8x1xi1> to vector<8x128xi1>
      %62 = vector.broadcast %cst_22 : f32 to vector<8x128xf32>
      %63 = arith.select %61, %50, %62 : vector<8x128xi1>, vector<8x128xf32>
      %c0_23 = arith.constant 0 : index
      %c0_24 = arith.constant 0 : index
      %c0_25 = arith.constant 0 : index
      %64 = vector.load %arg10[%c0_23, %c0_24, %c0_25] : memref<8x8x128xf32, #tpu.memory_space<vmem>>, vector<1x8x128xf32>
      %65 = vector.shape_cast %64 : vector<1x8x128xf32> to vector<8x128xf32>
      %66 = vector.shape_cast %63 : vector<8x128xf32> to vector<1x8x128xf32>
      tpu.vector_store %arg10[%c0_23, %c0_24, %c0_25], %66 {strides = array<i32>} : memref<8x8x128xf32, #tpu.memory_space<vmem>>, vector<1x8x128xf32>,
      %c1 = arith.constant 1 : index
      %c0_26 = arith.constant 0 : index
      %c0_27 = arith.constant 0 : index
      %67 = vector.load %arg4[%c1, %c0_26, %c0_27] : memref<8x8x16xbf16, #tpu.memory_space<vmem>>, vector<1x8x16xbf16>
      %68 = vector.shape_cast %67 : vector<1x8x16xbf16> to vector<8x16xbf16>
      %cst_28 = arith.constant dense<0.000000e+00> : vector<8x512xf32>
      %69 = tpu.matmul %68, %12, %cst_28 {dimension_numbers = #tpu.dot_dimension_numbers<[1], [0], [0], [1], [0, 0, 1, 1], [], []>} : vector<8x16xbf16>, vector<16x512xbf16>, vector<8x512xf32> -> vector<8x512xf32>
      %70 = vector.broadcast %14 : vector<1x512xf32> to vector<8x512xf32>
      %71 = arith.addf %69, %70 : vector<8x512xf32>
      %72 = arith.truncf %56 : vector<8x128xf32> to vector<8x128xbf16>
      %cst_29 = arith.constant dense<0.000000e+00> : vector<8x512xf32>
      %73 = tpu.matmul %72, %13, %cst_29 {dimension_numbers = #tpu.dot_dimension_numbers<[1], [0], [0], [1], [0, 0, 1, 1], [], []>} : vector<8x128xbf16>, vector<128x512xbf16>, vector<8x512xf32> -> vector<8x512xf32>
      %74 = arith.addf %71, %73 : vector<8x512xf32>
      %75 = vector.extract_strided_slice %74 {offsets = [0, 0], sizes = [8, 128], strides = [1, 1]} : vector<8x512xf32> to vector<8x128xf32>
      %76 = arith.negf %75 : vector<8x128xf32>
      %77 = math.exp %76 : vector<8x128xf32>
      %cst_30 = arith.constant 1.000000e+00 : f32
      %78 = vector.broadcast %cst_30 : f32 to vector<8x128xf32>
      %79 = arith.addf %78, %77 : vector<8x128xf32>
      %80 = arith.divf %78, %79 : vector<8x128xf32>
      %81 = vector.extract_strided_slice %74 {offsets = [0, 128], sizes = [8, 128], strides = [1, 1]} : vector<8x512xf32> to vector<8x128xf32>
      %82 = arith.negf %81 : vector<8x128xf32>
      %83 = math.exp %82 : vector<8x128xf32>
      %cst_31 = arith.constant 1.000000e+00 : f32
      %84 = vector.broadcast %cst_31 : f32 to vector<8x128xf32>
      %85 = arith.addf %84, %83 : vector<8x128xf32>
      %86 = arith.divf %84, %85 : vector<8x128xf32>
      %87 = vector.extract_strided_slice %74 {offsets = [0, 256], sizes = [8, 128], strides = [1, 1]} : vector<8x512xf32> to vector<8x128xf32>
      %88 = math.tanh %87 : vector<8x128xf32>
      %89 = vector.extract_strided_slice %74 {offsets = [0, 384], sizes = [8, 128], strides = [1, 1]} : vector<8x512xf32> to vector<8x128xf32>
      %90 = arith.negf %89 : vector<8x128xf32>
      %91 = math.exp %90 : vector<8x128xf32>
      %cst_32 = arith.constant 1.000000e+00 : f32
      %92 = vector.broadcast %cst_32 : f32 to vector<8x128xf32>
      %93 = arith.addf %92, %91 : vector<8x128xf32>
      %94 = arith.divf %92, %93 : vector<8x128xf32>
      %95 = arith.mulf %86, %59 : vector<8x128xf32>
      %96 = arith.mulf %80, %88 : vector<8x128xf32>
      %97 = arith.addf %95, %96 : vector<8x128xf32>
      %98 = math.tanh %97 : vector<8x128xf32>
      %99 = arith.mulf %94, %98 : vector<8x128xf32>
      %c1_i32 = arith.constant 1 : i32
      %100 = arith.addi %0, %c1_i32 : i32
      %101 = vector.broadcast %100 : i32 to vector<8x1xi32>
      %102 = arith.cmpi sgt, %15, %101 : vector<8x1xi32>
      %103 = vector.shape_cast %102 : vector<8x1xi1> to vector<8x1xi1>
      %104 = vector.broadcast %103 : vector<8x1xi1> to vector<8x128xi1>
      %105 = arith.select %104, %99, %56 : vector<8x128xi1>, vector<8x128xf32>
      %106 = vector.shape_cast %102 : vector<8x1xi1> to vector<8x1xi1>
      %107 = vector.broadcast %106 : vector<8x1xi1> to vector<8x128xi1>
      %108 = arith.select %107, %97, %59 : vector<8x128xi1>, vector<8x128xf32>
      %cst_33 = arith.constant 0.000000e+00 : f32
      %109 = vector.shape_cast %102 : vector<8x1xi1> to vector<8x1xi1>
      %110 = vector.broadcast %109 : vector<8x1xi1> to vector<8x128xi1>
      %111 = vector.broadcast %cst_33 : f32 to vector<8x128xf32>
      %112 = arith.select %110, %99, %111 : vector<8x128xi1>, vector<8x128xf32>
      %c1_34 = arith.constant 1 : index
      %c0_35 = arith.constant 0 : index
      %c0_36 = arith.constant 0 : index
      %113 = vector.load %arg10[%c1_34, %c0_35, %c0_36] : memref<8x8x128xf32, #tpu.memory_space<vmem>>, vector<1x8x128xf32>
      %114 = vector.shape_cast %113 : vector<1x8x128xf32> to vector<8x128xf32>
      %115 = vector.shape_cast %112 : vector<8x128xf32> to vector<1x8x128xf32>
      tpu.vector_store %arg10[%c1_34, %c0_35, %c0_36], %115 {strides = array<i32>} : memref<8x8x128xf32, #tpu.memory_space<vmem>>, vector<1x8x128xf32>,
      %c2 = arith.constant 2 : index
      %c0_37 = arith.constant 0 : index
      %c0_38 = arith.constant 0 : index
      %116 = vector.load %arg4[%c2, %c0_37, %c0_38] : memref<8x8x16xbf16, #tpu.memory_space<vmem>>, vector<1x8x16xbf16>
      %117 = vector.shape_cast %116 : vector<1x8x16xbf16> to vector<8x16xbf16>
      %cst_39 = arith.constant dense<0.000000e+00> : vector<8x512xf32>
      %118 = tpu.matmul %117, %12, %cst_39 {dimension_numbers = #tpu.dot_dimension_numbers<[1], [0], [0], [1], [0, 0, 1, 1], [], []>} : vector<8x16xbf16>, vector<16x512xbf16>, vector<8x512xf32> -> vector<8x512xf32>
      %119 = vector.broadcast %14 : vector<1x512xf32> to vector<8x512xf32>
      %120 = arith.addf %118, %119 : vector<8x512xf32>
      %121 = arith.truncf %105 : vector<8x128xf32> to vector<8x128xbf16>
      %cst_40 = arith.constant dense<0.000000e+00> : vector<8x512xf32>
      %122 = tpu.matmul %121, %13, %cst_40 {dimension_numbers = #tpu.dot_dimension_numbers<[1], [0], [0], [1], [0, 0, 1, 1], [], []>} : vector<8x128xbf16>, vector<128x512xbf16>, vector<8x512xf32> -> vector<8x512xf32>
      %123 = arith.addf %120, %122 : vector<8x512xf32>
      %124 = vector.extract_strided_slice %123 {offsets = [0, 0], sizes = [8, 128], strides = [1, 1]} : vector<8x512xf32> to vector<8x128xf32>
      %125 = arith.negf %124 : vector<8x128xf32>
      %126 = math.exp %125 : vector<8x128xf32>
      %cst_41 = arith.constant 1.000000e+00 : f32
      %127 = vector.broadcast %cst_41 : f32 to vector<8x128xf32>
      %128 = arith.addf %127, %126 : vector<8x128xf32>
      %129 = arith.divf %127, %128 : vector<8x128xf32>
      %130 = vector.extract_strided_slice %123 {offsets = [0, 128], sizes = [8, 128], strides = [1, 1]} : vector<8x512xf32> to vector<8x128xf32>
      %131 = arith.negf %130 : vector<8x128xf32>
      %132 = math.exp %131 : vector<8x128xf32>
      %cst_42 = arith.constant 1.000000e+00 : f32
      %133 = vector.broadcast %cst_42 : f32 to vector<8x128xf32>
      %134 = arith.addf %133, %132 : vector<8x128xf32>
      %135 = arith.divf %133, %134 : vector<8x128xf32>
      %136 = vector.extract_strided_slice %123 {offsets = [0, 256], sizes = [8, 128], strides = [1, 1]} : vector<8x512xf32> to vector<8x128xf32>
      %137 = math.tanh %136 : vector<8x128xf32>
      %138 = vector.extract_strided_slice %123 {offsets = [0, 384], sizes = [8, 128], strides = [1, 1]} : vector<8x512xf32> to vector<8x128xf32>
      %139 = arith.negf %138 : vector<8x128xf32>
      %140 = math.exp %139 : vector<8x128xf32>
      %cst_43 = arith.constant 1.000000e+00 : f32
      %141 = vector.broadcast %cst_43 : f32 to vector<8x128xf32>
      %142 = arith.addf %141, %140 : vector<8x128xf32>
      %143 = arith.divf %141, %142 : vector<8x128xf32>
      %144 = arith.mulf %135, %108 : vector<8x128xf32>
      %145 = arith.mulf %129, %137 : vector<8x128xf32>
      %146 = arith.addf %144, %145 : vector<8x128xf32>
      %147 = math.tanh %146 : vector<8x128xf32>
      %148 = arith.mulf %143, %147 : vector<8x128xf32>
      %c2_i32 = arith.constant 2 : i32
      %149 = arith.addi %0, %c2_i32 : i32
      %150 = vector.broadcast %149 : i32 to vector<8x1xi32>
      %151 = arith.cmpi sgt, %15, %150 : vector<8x1xi32>
      %152 = vector.shape_cast %151 : vector<8x1xi1> to vector<8x1xi1>
      %153 = vector.broadcast %152 : vector<8x1xi1> to vector<8x128xi1>
      %154 = arith.select %153, %148, %105 : vector<8x128xi1>, vector<8x128xf32>
      %155 = vector.shape_cast %151 : vector<8x1xi1> to vector<8x1xi1>
      %156 = vector.broadcast %155 : vector<8x1xi1> to vector<8x128xi1>
      %157 = arith.select %156, %146, %108 : vector<8x128xi1>, vector<8x128xf32>
      %cst_44 = arith.constant 0.000000e+00 : f32
      %158 = vector.shape_cast %151 : vector<8x1xi1> to vector<8x1xi1>
      %159 = vector.broadcast %158 : vector<8x1xi1> to vector<8x128xi1>
      %160 = vector.broadcast %cst_44 : f32 to vector<8x128xf32>
      %161 = arith.select %159, %148, %160 : vector<8x128xi1>, vector<8x128xf32>
      %c2_45 = arith.constant 2 : index
      %c0_46 = arith.constant 0 : index
      %c0_47 = arith.constant 0 : index
      %162 = vector.load %arg10[%c2_45, %c0_46, %c0_47] : memref<8x8x128xf32, #tpu.memory_space<vmem>>, vector<1x8x128xf32>
      %163 = vector.shape_cast %162 : vector<1x8x128xf32> to vector<8x128xf32>
      %164 = vector.shape_cast %161 : vector<8x128xf32> to vector<1x8x128xf32>
      tpu.vector_store %arg10[%c2_45, %c0_46, %c0_47], %164 {strides = array<i32>} : memref<8x8x128xf32, #tpu.memory_space<vmem>>, vector<1x8x128xf32>,
      %c3 = arith.constant 3 : index
      %c0_48 = arith.constant 0 : index
      %c0_49 = arith.constant 0 : index
      %165 = vector.load %arg4[%c3, %c0_48, %c0_49] : memref<8x8x16xbf16, #tpu.memory_space<vmem>>, vector<1x8x16xbf16>
      %166 = vector.shape_cast %165 : vector<1x8x16xbf16> to vector<8x16xbf16>
      %cst_50 = arith.constant dense<0.000000e+00> : vector<8x512xf32>
      %167 = tpu.matmul %166, %12, %cst_50 {dimension_numbers = #tpu.dot_dimension_numbers<[1], [0], [0], [1], [0, 0, 1, 1], [], []>} : vector<8x16xbf16>, vector<16x512xbf16>, vector<8x512xf32> -> vector<8x512xf32>
      %168 = vector.broadcast %14 : vector<1x512xf32> to vector<8x512xf32>
      %169 = arith.addf %167, %168 : vector<8x512xf32>
      %170 = arith.truncf %154 : vector<8x128xf32> to vector<8x128xbf16>
      %cst_51 = arith.constant dense<0.000000e+00> : vector<8x512xf32>
      %171 = tpu.matmul %170, %13, %cst_51 {dimension_numbers = #tpu.dot_dimension_numbers<[1], [0], [0], [1], [0, 0, 1, 1], [], []>} : vector<8x128xbf16>, vector<128x512xbf16>, vector<8x512xf32> -> vector<8x512xf32>
      %172 = arith.addf %169, %171 : vector<8x512xf32>
      %173 = vector.extract_strided_slice %172 {offsets = [0, 0], sizes = [8, 128], strides = [1, 1]} : vector<8x512xf32> to vector<8x128xf32>
      %174 = arith.negf %173 : vector<8x128xf32>
      %175 = math.exp %174 : vector<8x128xf32>
      %cst_52 = arith.constant 1.000000e+00 : f32
      %176 = vector.broadcast %cst_52 : f32 to vector<8x128xf32>
      %177 = arith.addf %176, %175 : vector<8x128xf32>
      %178 = arith.divf %176, %177 : vector<8x128xf32>
      %179 = vector.extract_strided_slice %172 {offsets = [0, 128], sizes = [8, 128], strides = [1, 1]} : vector<8x512xf32> to vector<8x128xf32>
      %180 = arith.negf %179 : vector<8x128xf32>
      %181 = math.exp %180 : vector<8x128xf32>
      %cst_53 = arith.constant 1.000000e+00 : f32
      %182 = vector.broadcast %cst_53 : f32 to vector<8x128xf32>
      %183 = arith.addf %182, %181 : vector<8x128xf32>
      %184 = arith.divf %182, %183 : vector<8x128xf32>
      %185 = vector.extract_strided_slice %172 {offsets = [0, 256], sizes = [8, 128], strides = [1, 1]} : vector<8x512xf32> to vector<8x128xf32>
      %186 = math.tanh %185 : vector<8x128xf32>
      %187 = vector.extract_strided_slice %172 {offsets = [0, 384], sizes = [8, 128], strides = [1, 1]} : vector<8x512xf32> to vector<8x128xf32>
      %188 = arith.negf %187 : vector<8x128xf32>
      %189 = math.exp %188 : vector<8x128xf32>
      %cst_54 = arith.constant 1.000000e+00 : f32
      %190 = vector.broadcast %cst_54 : f32 to vector<8x128xf32>
      %191 = arith.addf %190, %189 : vector<8x128xf32>
      %192 = arith.divf %190, %191 : vector<8x128xf32>
      %193 = arith.mulf %184, %157 : vector<8x128xf32>
      %194 = arith.mulf %178, %186 : vector<8x128xf32>
      %195 = arith.addf %193, %194 : vector<8x128xf32>
      %196 = math.tanh %195 : vector<8x128xf32>
      %197 = arith.mulf %192, %196 : vector<8x128xf32>
      %c3_i32 = arith.constant 3 : i32
      %198 = arith.addi %0, %c3_i32 : i32
      %199 = vector.broadcast %198 : i32 to vector<8x1xi32>
      %200 = arith.cmpi sgt, %15, %199 : vector<8x1xi32>
      %201 = vector.shape_cast %200 : vector<8x1xi1> to vector<8x1xi1>
      %202 = vector.broadcast %201 : vector<8x1xi1> to vector<8x128xi1>
      %203 = arith.select %202, %197, %154 : vector<8x128xi1>, vector<8x128xf32>
      %204 = vector.shape_cast %200 : vector<8x1xi1> to vector<8x1xi1>
      %205 = vector.broadcast %204 : vector<8x1xi1> to vector<8x128xi1>
      %206 = arith.select %205, %195, %157 : vector<8x128xi1>, vector<8x128xf32>
      %cst_55 = arith.constant 0.000000e+00 : f32
      %207 = vector.shape_cast %200 : vector<8x1xi1> to vector<8x1xi1>
      %208 = vector.broadcast %207 : vector<8x1xi1> to vector<8x128xi1>
      %209 = vector.broadcast %cst_55 : f32 to vector<8x128xf32>
      %210 = arith.select %208, %197, %209 : vector<8x128xi1>, vector<8x128xf32>
      %c3_56 = arith.constant 3 : index
      %c0_57 = arith.constant 0 : index
      %c0_58 = arith.constant 0 : index
      %211 = vector.load %arg10[%c3_56, %c0_57, %c0_58] : memref<8x8x128xf32, #tpu.memory_space<vmem>>, vector<1x8x128xf32>
      %212 = vector.shape_cast %211 : vector<1x8x128xf32> to vector<8x128xf32>
      %213 = vector.shape_cast %210 : vector<8x128xf32> to vector<1x8x128xf32>
      tpu.vector_store %arg10[%c3_56, %c0_57, %c0_58], %213 {strides = array<i32>} : memref<8x8x128xf32, #tpu.memory_space<vmem>>, vector<1x8x128xf32>,
      %c4 = arith.constant 4 : index
      %c0_59 = arith.constant 0 : index
      %c0_60 = arith.constant 0 : index
      %214 = vector.load %arg4[%c4, %c0_59, %c0_60] : memref<8x8x16xbf16, #tpu.memory_space<vmem>>, vector<1x8x16xbf16>
      %215 = vector.shape_cast %214 : vector<1x8x16xbf16> to vector<8x16xbf16>
      %cst_61 = arith.constant dense<0.000000e+00> : vector<8x512xf32>
      %216 = tpu.matmul %215, %12, %cst_61 {dimension_numbers = #tpu.dot_dimension_numbers<[1], [0], [0], [1], [0, 0, 1, 1], [], []>} : vector<8x16xbf16>, vector<16x512xbf16>, vector<8x512xf32> -> vector<8x512xf32>
      %217 = vector.broadcast %14 : vector<1x512xf32> to vector<8x512xf32>
      %218 = arith.addf %216, %217 : vector<8x512xf32>
      %219 = arith.truncf %203 : vector<8x128xf32> to vector<8x128xbf16>
      %cst_62 = arith.constant dense<0.000000e+00> : vector<8x512xf32>
      %220 = tpu.matmul %219, %13, %cst_62 {dimension_numbers = #tpu.dot_dimension_numbers<[1], [0], [0], [1], [0, 0, 1, 1], [], []>} : vector<8x128xbf16>, vector<128x512xbf16>, vector<8x512xf32> -> vector<8x512xf32>
      %221 = arith.addf %218, %220 : vector<8x512xf32>
      %222 = vector.extract_strided_slice %221 {offsets = [0, 0], sizes = [8, 128], strides = [1, 1]} : vector<8x512xf32> to vector<8x128xf32>
      %223 = arith.negf %222 : vector<8x128xf32>
      %224 = math.exp %223 : vector<8x128xf32>
      %cst_63 = arith.constant 1.000000e+00 : f32
      %225 = vector.broadcast %cst_63 : f32 to vector<8x128xf32>
      %226 = arith.addf %225, %224 : vector<8x128xf32>
      %227 = arith.divf %225, %226 : vector<8x128xf32>
      %228 = vector.extract_strided_slice %221 {offsets = [0, 128], sizes = [8, 128], strides = [1, 1]} : vector<8x512xf32> to vector<8x128xf32>
      %229 = arith.negf %228 : vector<8x128xf32>
      %230 = math.exp %229 : vector<8x128xf32>
      %cst_64 = arith.constant 1.000000e+00 : f32
      %231 = vector.broadcast %cst_64 : f32 to vector<8x128xf32>
      %232 = arith.addf %231, %230 : vector<8x128xf32>
      %233 = arith.divf %231, %232 : vector<8x128xf32>
      %234 = vector.extract_strided_slice %221 {offsets = [0, 256], sizes = [8, 128], strides = [1, 1]} : vector<8x512xf32> to vector<8x128xf32>
      %235 = math.tanh %234 : vector<8x128xf32>
      %236 = vector.extract_strided_slice %221 {offsets = [0, 384], sizes = [8, 128], strides = [1, 1]} : vector<8x512xf32> to vector<8x128xf32>
      %237 = arith.negf %236 : vector<8x128xf32>
      %238 = math.exp %237 : vector<8x128xf32>
      %cst_65 = arith.constant 1.000000e+00 : f32
      %239 = vector.broadcast %cst_65 : f32 to vector<8x128xf32>
      %240 = arith.addf %239, %238 : vector<8x128xf32>
      %241 = arith.divf %239, %240 : vector<8x128xf32>
      %242 = arith.mulf %233, %206 : vector<8x128xf32>
      %243 = arith.mulf %227, %235 : vector<8x128xf32>
      %244 = arith.addf %242, %243 : vector<8x128xf32>
      %245 = math.tanh %244 : vector<8x128xf32>
      %246 = arith.mulf %241, %245 : vector<8x128xf32>
      %c4_i32 = arith.constant 4 : i32
      %247 = arith.addi %0, %c4_i32 : i32
      %248 = vector.broadcast %247 : i32 to vector<8x1xi32>
      %249 = arith.cmpi sgt, %15, %248 : vector<8x1xi32>
      %250 = vector.shape_cast %249 : vector<8x1xi1> to vector<8x1xi1>
      %251 = vector.broadcast %250 : vector<8x1xi1> to vector<8x128xi1>
      %252 = arith.select %251, %246, %203 : vector<8x128xi1>, vector<8x128xf32>
      %253 = vector.shape_cast %249 : vector<8x1xi1> to vector<8x1xi1>
      %254 = vector.broadcast %253 : vector<8x1xi1> to vector<8x128xi1>
      %255 = arith.select %254, %244, %206 : vector<8x128xi1>, vector<8x128xf32>
      %cst_66 = arith.constant 0.000000e+00 : f32
      %256 = vector.shape_cast %249 : vector<8x1xi1> to vector<8x1xi1>
      %257 = vector.broadcast %256 : vector<8x1xi1> to vector<8x128xi1>
      %258 = vector.broadcast %cst_66 : f32 to vector<8x128xf32>
      %259 = arith.select %257, %246, %258 : vector<8x128xi1>, vector<8x128xf32>
      %c4_67 = arith.constant 4 : index
      %c0_68 = arith.constant 0 : index
      %c0_69 = arith.constant 0 : index
      %260 = vector.load %arg10[%c4_67, %c0_68, %c0_69] : memref<8x8x128xf32, #tpu.memory_space<vmem>>, vector<1x8x128xf32>
      %261 = vector.shape_cast %260 : vector<1x8x128xf32> to vector<8x128xf32>
      %262 = vector.shape_cast %259 : vector<8x128xf32> to vector<1x8x128xf32>
      tpu.vector_store %arg10[%c4_67, %c0_68, %c0_69], %262 {strides = array<i32>} : memref<8x8x128xf32, #tpu.memory_space<vmem>>, vector<1x8x128xf32>,
      %c5 = arith.constant 5 : index
      %c0_70 = arith.constant 0 : index
      %c0_71 = arith.constant 0 : index
      %263 = vector.load %arg4[%c5, %c0_70, %c0_71] : memref<8x8x16xbf16, #tpu.memory_space<vmem>>, vector<1x8x16xbf16>
      %264 = vector.shape_cast %263 : vector<1x8x16xbf16> to vector<8x16xbf16>
      %cst_72 = arith.constant dense<0.000000e+00> : vector<8x512xf32>
      %265 = tpu.matmul %264, %12, %cst_72 {dimension_numbers = #tpu.dot_dimension_numbers<[1], [0], [0], [1], [0, 0, 1, 1], [], []>} : vector<8x16xbf16>, vector<16x512xbf16>, vector<8x512xf32> -> vector<8x512xf32>
      %266 = vector.broadcast %14 : vector<1x512xf32> to vector<8x512xf32>
      %267 = arith.addf %265, %266 : vector<8x512xf32>
      %268 = arith.truncf %252 : vector<8x128xf32> to vector<8x128xbf16>
      %cst_73 = arith.constant dense<0.000000e+00> : vector<8x512xf32>
      %269 = tpu.matmul %268, %13, %cst_73 {dimension_numbers = #tpu.dot_dimension_numbers<[1], [0], [0], [1], [0, 0, 1, 1], [], []>} : vector<8x128xbf16>, vector<128x512xbf16>, vector<8x512xf32> -> vector<8x512xf32>
      %270 = arith.addf %267, %269 : vector<8x512xf32>
      %271 = vector.extract_strided_slice %270 {offsets = [0, 0], sizes = [8, 128], strides = [1, 1]} : vector<8x512xf32> to vector<8x128xf32>
      %272 = arith.negf %271 : vector<8x128xf32>
      %273 = math.exp %272 : vector<8x128xf32>
      %cst_74 = arith.constant 1.000000e+00 : f32
      %274 = vector.broadcast %cst_74 : f32 to vector<8x128xf32>
      %275 = arith.addf %274, %273 : vector<8x128xf32>
      %276 = arith.divf %274, %275 : vector<8x128xf32>
      %277 = vector.extract_strided_slice %270 {offsets = [0, 128], sizes = [8, 128], strides = [1, 1]} : vector<8x512xf32> to vector<8x128xf32>
      %278 = arith.negf %277 : vector<8x128xf32>
      %279 = math.exp %278 : vector<8x128xf32>
      %cst_75 = arith.constant 1.000000e+00 : f32
      %280 = vector.broadcast %cst_75 : f32 to vector<8x128xf32>
      %281 = arith.addf %280, %279 : vector<8x128xf32>
      %282 = arith.divf %280, %281 : vector<8x128xf32>
      %283 = vector.extract_strided_slice %270 {offsets = [0, 256], sizes = [8, 128], strides = [1, 1]} : vector<8x512xf32> to vector<8x128xf32>
      %284 = math.tanh %283 : vector<8x128xf32>
      %285 = vector.extract_strided_slice %270 {offsets = [0, 384], sizes = [8, 128], strides = [1, 1]} : vector<8x512xf32> to vector<8x128xf32>
      %286 = arith.negf %285 : vector<8x128xf32>
      %287 = math.exp %286 : vector<8x128xf32>
      %cst_76 = arith.constant 1.000000e+00 : f32
      %288 = vector.broadcast %cst_76 : f32 to vector<8x128xf32>
      %289 = arith.addf %288, %287 : vector<8x128xf32>
      %290 = arith.divf %288, %289 : vector<8x128xf32>
      %291 = arith.mulf %282, %255 : vector<8x128xf32>
      %292 = arith.mulf %276, %284 : vector<8x128xf32>
      %293 = arith.addf %291, %292 : vector<8x128xf32>
      %294 = math.tanh %293 : vector<8x128xf32>
      %295 = arith.mulf %290, %294 : vector<8x128xf32>
      %c5_i32 = arith.constant 5 : i32
      %296 = arith.addi %0, %c5_i32 : i32
      %297 = vector.broadcast %296 : i32 to vector<8x1xi32>
      %298 = arith.cmpi sgt, %15, %297 : vector<8x1xi32>
      %299 = vector.shape_cast %298 : vector<8x1xi1> to vector<8x1xi1>
      %300 = vector.broadcast %299 : vector<8x1xi1> to vector<8x128xi1>
      %301 = arith.select %300, %295, %252 : vector<8x128xi1>, vector<8x128xf32>
      %302 = vector.shape_cast %298 : vector<8x1xi1> to vector<8x1xi1>
      %303 = vector.broadcast %302 : vector<8x1xi1> to vector<8x128xi1>
      %304 = arith.select %303, %293, %255 : vector<8x128xi1>, vector<8x128xf32>
      %cst_77 = arith.constant 0.000000e+00 : f32
      %305 = vector.shape_cast %298 : vector<8x1xi1> to vector<8x1xi1>
      %306 = vector.broadcast %305 : vector<8x1xi1> to vector<8x128xi1>
      %307 = vector.broadcast %cst_77 : f32 to vector<8x128xf32>
      %308 = arith.select %306, %295, %307 : vector<8x128xi1>, vector<8x128xf32>
      %c5_78 = arith.constant 5 : index
      %c0_79 = arith.constant 0 : index
      %c0_80 = arith.constant 0 : index
      %309 = vector.load %arg10[%c5_78, %c0_79, %c0_80] : memref<8x8x128xf32, #tpu.memory_space<vmem>>, vector<1x8x128xf32>
      %310 = vector.shape_cast %309 : vector<1x8x128xf32> to vector<8x128xf32>
      %311 = vector.shape_cast %308 : vector<8x128xf32> to vector<1x8x128xf32>
      tpu.vector_store %arg10[%c5_78, %c0_79, %c0_80], %311 {strides = array<i32>} : memref<8x8x128xf32, #tpu.memory_space<vmem>>, vector<1x8x128xf32>,
      %c6 = arith.constant 6 : index
      %c0_81 = arith.constant 0 : index
      %c0_82 = arith.constant 0 : index
      %312 = vector.load %arg4[%c6, %c0_81, %c0_82] : memref<8x8x16xbf16, #tpu.memory_space<vmem>>, vector<1x8x16xbf16>
      %313 = vector.shape_cast %312 : vector<1x8x16xbf16> to vector<8x16xbf16>
      %cst_83 = arith.constant dense<0.000000e+00> : vector<8x512xf32>
      %314 = tpu.matmul %313, %12, %cst_83 {dimension_numbers = #tpu.dot_dimension_numbers<[1], [0], [0], [1], [0, 0, 1, 1], [], []>} : vector<8x16xbf16>, vector<16x512xbf16>, vector<8x512xf32> -> vector<8x512xf32>
      %315 = vector.broadcast %14 : vector<1x512xf32> to vector<8x512xf32>
      %316 = arith.addf %314, %315 : vector<8x512xf32>
      %317 = arith.truncf %301 : vector<8x128xf32> to vector<8x128xbf16>
      %cst_84 = arith.constant dense<0.000000e+00> : vector<8x512xf32>
      %318 = tpu.matmul %317, %13, %cst_84 {dimension_numbers = #tpu.dot_dimension_numbers<[1], [0], [0], [1], [0, 0, 1, 1], [], []>} : vector<8x128xbf16>, vector<128x512xbf16>, vector<8x512xf32> -> vector<8x512xf32>
      %319 = arith.addf %316, %318 : vector<8x512xf32>
      %320 = vector.extract_strided_slice %319 {offsets = [0, 0], sizes = [8, 128], strides = [1, 1]} : vector<8x512xf32> to vector<8x128xf32>
      %321 = arith.negf %320 : vector<8x128xf32>
      %322 = math.exp %321 : vector<8x128xf32>
      %cst_85 = arith.constant 1.000000e+00 : f32
      %323 = vector.broadcast %cst_85 : f32 to vector<8x128xf32>
      %324 = arith.addf %323, %322 : vector<8x128xf32>
      %325 = arith.divf %323, %324 : vector<8x128xf32>
      %326 = vector.extract_strided_slice %319 {offsets = [0, 128], sizes = [8, 128], strides = [1, 1]} : vector<8x512xf32> to vector<8x128xf32>
      %327 = arith.negf %326 : vector<8x128xf32>
      %328 = math.exp %327 : vector<8x128xf32>
      %cst_86 = arith.constant 1.000000e+00 : f32
      %329 = vector.broadcast %cst_86 : f32 to vector<8x128xf32>
      %330 = arith.addf %329, %328 : vector<8x128xf32>
      %331 = arith.divf %329, %330 : vector<8x128xf32>
      %332 = vector.extract_strided_slice %319 {offsets = [0, 256], sizes = [8, 128], strides = [1, 1]} : vector<8x512xf32> to vector<8x128xf32>
      %333 = math.tanh %332 : vector<8x128xf32>
      %334 = vector.extract_strided_slice %319 {offsets = [0, 384], sizes = [8, 128], strides = [1, 1]} : vector<8x512xf32> to vector<8x128xf32>
      %335 = arith.negf %334 : vector<8x128xf32>
      %336 = math.exp %335 : vector<8x128xf32>
      %cst_87 = arith.constant 1.000000e+00 : f32
      %337 = vector.broadcast %cst_87 : f32 to vector<8x128xf32>
      %338 = arith.addf %337, %336 : vector<8x128xf32>
      %339 = arith.divf %337, %338 : vector<8x128xf32>
      %340 = arith.mulf %331, %304 : vector<8x128xf32>
      %341 = arith.mulf %325, %333 : vector<8x128xf32>
      %342 = arith.addf %340, %341 : vector<8x128xf32>
      %343 = math.tanh %342 : vector<8x128xf32>
      %344 = arith.mulf %339, %343 : vector<8x128xf32>
      %c6_i32 = arith.constant 6 : i32
      %345 = arith.addi %0, %c6_i32 : i32
      %346 = vector.broadcast %345 : i32 to vector<8x1xi32>
      %347 = arith.cmpi sgt, %15, %346 : vector<8x1xi32>
      %348 = vector.shape_cast %347 : vector<8x1xi1> to vector<8x1xi1>
      %349 = vector.broadcast %348 : vector<8x1xi1> to vector<8x128xi1>
      %350 = arith.select %349, %344, %301 : vector<8x128xi1>, vector<8x128xf32>
      %351 = vector.shape_cast %347 : vector<8x1xi1> to vector<8x1xi1>
      %352 = vector.broadcast %351 : vector<8x1xi1> to vector<8x128xi1>
      %353 = arith.select %352, %342, %304 : vector<8x128xi1>, vector<8x128xf32>
      %cst_88 = arith.constant 0.000000e+00 : f32
      %354 = vector.shape_cast %347 : vector<8x1xi1> to vector<8x1xi1>
      %355 = vector.broadcast %354 : vector<8x1xi1> to vector<8x128xi1>
      %356 = vector.broadcast %cst_88 : f32 to vector<8x128xf32>
      %357 = arith.select %355, %344, %356 : vector<8x128xi1>, vector<8x128xf32>
      %c6_89 = arith.constant 6 : index
      %c0_90 = arith.constant 0 : index
      %c0_91 = arith.constant 0 : index
      %358 = vector.load %arg10[%c6_89, %c0_90, %c0_91] : memref<8x8x128xf32, #tpu.memory_space<vmem>>, vector<1x8x128xf32>
      %359 = vector.shape_cast %358 : vector<1x8x128xf32> to vector<8x128xf32>
      %360 = vector.shape_cast %357 : vector<8x128xf32> to vector<1x8x128xf32>
      tpu.vector_store %arg10[%c6_89, %c0_90, %c0_91], %360 {strides = array<i32>} : memref<8x8x128xf32, #tpu.memory_space<vmem>>, vector<1x8x128xf32>,
      %c7 = arith.constant 7 : index
      %c0_92 = arith.constant 0 : index
      %c0_93 = arith.constant 0 : index
      %361 = vector.load %arg4[%c7, %c0_92, %c0_93] : memref<8x8x16xbf16, #tpu.memory_space<vmem>>, vector<1x8x16xbf16>
      %362 = vector.shape_cast %361 : vector<1x8x16xbf16> to vector<8x16xbf16>
      %cst_94 = arith.constant dense<0.000000e+00> : vector<8x512xf32>
      %363 = tpu.matmul %362, %12, %cst_94 {dimension_numbers = #tpu.dot_dimension_numbers<[1], [0], [0], [1], [0, 0, 1, 1], [], []>} : vector<8x16xbf16>, vector<16x512xbf16>, vector<8x512xf32> -> vector<8x512xf32>
      %364 = vector.broadcast %14 : vector<1x512xf32> to vector<8x512xf32>
      %365 = arith.addf %363, %364 : vector<8x512xf32>
      %366 = arith.truncf %350 : vector<8x128xf32> to vector<8x128xbf16>
      %cst_95 = arith.constant dense<0.000000e+00> : vector<8x512xf32>
      %367 = tpu.matmul %366, %13, %cst_95 {dimension_numbers = #tpu.dot_dimension_numbers<[1], [0], [0], [1], [0, 0, 1, 1], [], []>} : vector<8x128xbf16>, vector<128x512xbf16>, vector<8x512xf32> -> vector<8x512xf32>
      %368 = arith.addf %365, %367 : vector<8x512xf32>
      %369 = vector.extract_strided_slice %368 {offsets = [0, 0], sizes = [8, 128], strides = [1, 1]} : vector<8x512xf32> to vector<8x128xf32>
      %370 = arith.negf %369 : vector<8x128xf32>
      %371 = math.exp %370 : vector<8x128xf32>
      %cst_96 = arith.constant 1.000000e+00 : f32
      %372 = vector.broadcast %cst_96 : f32 to vector<8x128xf32>
      %373 = arith.addf %372, %371 : vector<8x128xf32>
      %374 = arith.divf %372, %373 : vector<8x128xf32>
      %375 = vector.extract_strided_slice %368 {offsets = [0, 128], sizes = [8, 128], strides = [1, 1]} : vector<8x512xf32> to vector<8x128xf32>
      %376 = arith.negf %375 : vector<8x128xf32>
      %377 = math.exp %376 : vector<8x128xf32>
      %cst_97 = arith.constant 1.000000e+00 : f32
      %378 = vector.broadcast %cst_97 : f32 to vector<8x128xf32>
      %379 = arith.addf %378, %377 : vector<8x128xf32>
      %380 = arith.divf %378, %379 : vector<8x128xf32>
      %381 = vector.extract_strided_slice %368 {offsets = [0, 256], sizes = [8, 128], strides = [1, 1]} : vector<8x512xf32> to vector<8x128xf32>
      %382 = math.tanh %381 : vector<8x128xf32>
      %383 = vector.extract_strided_slice %368 {offsets = [0, 384], sizes = [8, 128], strides = [1, 1]} : vector<8x512xf32> to vector<8x128xf32>
      %384 = arith.negf %383 : vector<8x128xf32>
      %385 = math.exp %384 : vector<8x128xf32>
      %cst_98 = arith.constant 1.000000e+00 : f32
      %386 = vector.broadcast %cst_98 : f32 to vector<8x128xf32>
      %387 = arith.addf %386, %385 : vector<8x128xf32>
      %388 = arith.divf %386, %387 : vector<8x128xf32>
      %389 = arith.mulf %380, %353 : vector<8x128xf32>
      %390 = arith.mulf %374, %382 : vector<8x128xf32>
      %391 = arith.addf %389, %390 : vector<8x128xf32>
      %392 = math.tanh %391 : vector<8x128xf32>
      %393 = arith.mulf %388, %392 : vector<8x128xf32>
      %c7_i32 = arith.constant 7 : i32
      %394 = arith.addi %0, %c7_i32 : i32
      %395 = vector.broadcast %394 : i32 to vector<8x1xi32>
      %396 = arith.cmpi sgt, %15, %395 : vector<8x1xi32>
      %397 = vector.shape_cast %396 : vector<8x1xi1> to vector<8x1xi1>
      %398 = vector.broadcast %397 : vector<8x1xi1> to vector<8x128xi1>
      %399 = arith.select %398, %393, %350 : vector<8x128xi1>, vector<8x128xf32>
      %400 = vector.shape_cast %396 : vector<8x1xi1> to vector<8x1xi1>
      %401 = vector.broadcast %400 : vector<8x1xi1> to vector<8x128xi1>
      %402 = arith.select %401, %391, %353 : vector<8x128xi1>, vector<8x128xf32>
      %cst_99 = arith.constant 0.000000e+00 : f32
      %403 = vector.shape_cast %396 : vector<8x1xi1> to vector<8x1xi1>
      %404 = vector.broadcast %403 : vector<8x1xi1> to vector<8x128xi1>
      %405 = vector.broadcast %cst_99 : f32 to vector<8x128xf32>
      %406 = arith.select %404, %393, %405 : vector<8x128xi1>, vector<8x128xf32>
      %c7_100 = arith.constant 7 : index
      %c0_101 = arith.constant 0 : index
      %c0_102 = arith.constant 0 : index
      %407 = vector.load %arg10[%c7_100, %c0_101, %c0_102] : memref<8x8x128xf32, #tpu.memory_space<vmem>>, vector<1x8x128xf32>
      %408 = vector.shape_cast %407 : vector<1x8x128xf32> to vector<8x128xf32>
      %409 = vector.shape_cast %406 : vector<8x128xf32> to vector<1x8x128xf32>
      tpu.vector_store %arg10[%c7_100, %c0_101, %c0_102], %409 {strides = array<i32>} : memref<8x8x128xf32, #tpu.memory_space<vmem>>, vector<1x8x128xf32>,
      %c0_103 = arith.constant 0 : index
      %c0_104 = arith.constant 0 : index
      %410 = vector.load %arg11[%c0_103, %c0_104] : memref<8x128xf32, #tpu.memory_space<vmem>>, vector<8x128xf32>
      tpu.vector_store %arg11[%c0_103, %c0_104], %399 {strides = array<i32>} : memref<8x128xf32, #tpu.memory_space<vmem>>, vector<8x128xf32>,
      %c0_105 = arith.constant 0 : index
      %c0_106 = arith.constant 0 : index
      %411 = vector.load %arg12[%c0_105, %c0_106] : memref<8x128xf32, #tpu.memory_space<vmem>>, vector<8x128xf32>
      tpu.vector_store %arg12[%c0_105, %c0_106], %402 {strides = array<i32>} : memref<8x128xf32, #tpu.memory_space<vmem>>, vector<8x128xf32>,
    } else {
    }
    return
  }
  func.func @transform_0(%arg0: i32, %arg1: i32, %arg2: memref<1xi32, #tpu.memory_space<smem>>) -> (i32, i32) {
    %c0_i32 = arith.constant 0 : i32
    %c0_i32_0 = arith.constant 0 : i32
    return %arg0, %c0_i32 : i32, i32
  }
  func.func @transform_1(%arg0: i32, %arg1: i32, %arg2: memref<1xi32, #tpu.memory_space<smem>>) -> (i32, i32, i32) {
    %c0_i32 = arith.constant 0 : i32
    %c0_i32_0 = arith.constant 0 : i32
    return %arg1, %arg0, %c0_i32 : i32, i32, i32
  }
  func.func @transform_2(%arg0: i32, %arg1: i32, %arg2: memref<1xi32, #tpu.memory_space<smem>>) -> (i32, i32) {
    %c0_i32 = arith.constant 0 : i32
    %c0_i32_0 = arith.constant 0 : i32
    %c0_i32_1 = arith.constant 0 : i32
    return %c0_i32, %c0_i32_0 : i32, i32
  }
  func.func @transform_3(%arg0: i32, %arg1: i32, %arg2: memref<1xi32, #tpu.memory_space<smem>>) -> (i32, i32) {
    %c0_i32 = arith.constant 0 : i32
    %c0_i32_0 = arith.constant 0 : i32
    %c0_i32_1 = arith.constant 0 : i32
    return %c0_i32, %c0_i32_0 : i32, i32
  }
  func.func @transform_4(%arg0: i32, %arg1: i32, %arg2: memref<1xi32, #tpu.memory_space<smem>>) -> (i32, i32) {
    %c0_i32 = arith.constant 0 : i32
    %c0_i32_0 = arith.constant 0 : i32
    %c0_i32_1 = arith.constant 0 : i32
    return %c0_i32, %c0_i32_0 : i32, i32
  }
  func.func @transform_5(%arg0: i32, %arg1: i32, %arg2: memref<1xi32, #tpu.memory_space<smem>>) -> (i32, i32) {
    %c0_i32 = arith.constant 0 : i32
    %c0_i32_0 = arith.constant 0 : i32
    return %arg0, %c0_i32 : i32, i32
  }
  func.func @transform_6(%arg0: i32, %arg1: i32, %arg2: memref<1xi32, #tpu.memory_space<smem>>) -> (i32, i32) {
    %c0_i32 = arith.constant 0 : i32
    %c0_i32_0 = arith.constant 0 : i32
    return %arg0, %c0_i32 : i32, i32
  }
  func.func @transform_7(%arg0: i32, %arg1: i32, %arg2: memref<1xi32, #tpu.memory_space<smem>>) -> (i32, i32, i32) {
    %c0_i32 = arith.constant 0 : i32
    %c0_i32_0 = arith.constant 0 : i32
    return %arg1, %arg0, %c0_i32 : i32, i32, i32
  }
}

</mosaic_0001>

<bundles_post_ra>
// kernel: tpu_custom_call.1
= control target key start
LH: loop header
LB: loop body
LE: loop exit
PB: predicated region body
PF: predicated region fallthrough
CT: control target
= control target key end

     0   :  { %14 = vsyncpa [#allocation7], 0  ;;  %s3198_s0 = inlined_call_operand.<no memory space> [shape: s32[1], index: 0, kind: input, shape index: {}]   ;;  %s3199_s1 = inlined_call_operand.vmem [shape: s32[8,1], index: 1, kind: input, shape index: {}]   ;;  %s3200_s2 = inlined_call_operand.hbm [shape: bf16[8,8,16], index: 2, kind: input, shape index: {}]   ;;  %s3201_s3 = inlined_call_operand.hbm [shape: bf16[16,512], index: 3, kind: input, shape index: {}]   ;;  %s3202_s4 = inlined_call_operand.hbm [shape: bf16[128,512], index: 4, kind: input, shape index: {}]   ;;  %s3203_s5 = inlined_call_operand.hbm [shape: f32[1,512], index: 5, kind: input, shape index: {}]   ;;  %s3204_s6 = inlined_call_operand.vmem [shape: f32[8,128], index: 6, kind: input, shape index: {}]   ;;  %s3205_s7 = inlined_call_operand.vmem [shape: f32[8,128], index: 7, kind: input, shape index: {}]   ;;  %s3206_s8 = inlined_call_operand.hbm [shape: f32[8,8,128], index: 8, kind: output, shape index: {}]  }
   0x1   :  { %15 = vsyncpa [#allocation10], 0 }
   0x2   :  { %16 = vsyncpa [#allocation13], 0 }
   0x3   :  { %17 = vsyncpa [#allocation8], 0  ;;  %s2478_s27 = smov [#allocation9]  }
   0x4   :  { %s37_s28 = sshll.u32 %s2478_s27, 4  ;;  %s38_s28 = int_to_ptr.vmem [resolvable:$true] %s37_s28 }
   0x5   :  { %s2378_s29 = scalar_lea.vmem %s38_s28, 512  ;;  %p2383_p1 = scmp.lt.s32.totalorder %s38_s28, %s38_s28 }
   0x6   :  { %p2379_p0 = scmp.ne.s32.totalorder %s38_s28, %s2378_s29  ;;  %p2384_p2 = scmp.lt.s32.totalorder %s2378_s29, %s2378_s29 }
   0x8   :  { %p2385_p3 = por %p2384_p2, %p2383_p1 }
   0xa   :  { %p2386_p4 = pnand %p2385_p3, %p2379_p0 }
   0xc   :  { %2389 = shalt.err (!%p2386_p4)
}
   0xd   :  { %s2479_s30 = smov 256   ;;  %s2480_s9 = smov 16  }
   0xe   :  { %43 = dma.hbm_to_vmem [thread:$0]  %s3201_s3, 512, %s38_s28, [#allocation10], %s2479_s30, %s2479_s30, %s2480_s9  }
   0xf   :  { %s2481_s12 = smov [#allocation6]  }
  0x10   :  { %s25_s13 = sshll.u32 %s2481_s12, 4  ;;  %s26_s13 = int_to_ptr.vmem [resolvable:$true] %s25_s13 }
  0x11   :  { %s2398_s14 = scalar_lea.vmem %s26_s13, 512  ;;  %p2403_p6 = scmp.lt.s32.totalorder %s26_s13, %s26_s13 }
  0x12   :  { %p2399_p5 = scmp.ne.s32.totalorder %s26_s13, %s2398_s14  ;;  %p2404_p7 = scmp.lt.s32.totalorder %s2398_s14, %s2398_s14 }
  0x14   :  { %p2405_p8 = por %p2404_p7, %p2403_p6 }
  0x16   :  { %p2406_p9 = pnand %p2405_p8, %p2399_p5 }
  0x18   :  { %2409 = shalt.err (!%p2406_p9)
}
  0x19   :  { %s2482_s15 = smov 64   ;;  %s2483_s16 = smov 4  }
  0x1a   :  { %31 = dma.hbm_to_vmem [thread:$0]  %s3200_s2, 512, %s26_s13, [#allocation7], %s2482_s15, %s2482_s15, %s2483_s16  }
  0x1b   :  { %s2484_s19 = smov [#allocation11]   ;;  %s2485_s21 = smov [#allocation12]  }
  0x1c   :  { %s49_s20 = sshll.u32 %s2484_s19, 4  ;;  %s62_s3 = sshll.u32 %s2485_s21, 4  ;;  %s50_s20 = int_to_ptr.vmem [resolvable:$true] %s49_s20  ;;  %s63_s3 = int_to_ptr.vmem [resolvable:$true] %s62_s3 }
  0x1d   :  { %s2418_s22 = scalar_lea.vmem %s50_s20, 4096  ;;  %p2423_p11 = scmp.lt.s32.totalorder %s50_s20, %s50_s20 }
  0x1e   :  { %p2419_p10 = scmp.ne.s32.totalorder %s50_s20, %s2418_s22  ;;  %p2424_p12 = scmp.lt.s32.totalorder %s2418_s22, %s2418_s22 }
  0x20   :  { %p2425_p13 = por %p2424_p12, %p2423_p11 }
  0x22   :  { %p2426_p0 = pnand %p2425_p13, %p2419_p10 }
  0x24   :  { %2429 = shalt.err (!%p2426_p0)
}
  0x25   :  { %55 = dma.hbm_to_vmem [thread:$0]  %s3202_s4, 4096, %s50_s20, [#allocation10], %s2479_s30, %s2479_s30, %s2480_s9  }
  0x26   :  { %s2438_s2 = scalar_lea.vmem %s63_s3, 64  ;;  %p2443_p2 = scmp.lt.s32.totalorder %s63_s3, %s63_s3 }
  0x27   :  { %p2439_p1 = scmp.ne.s32.totalorder %s63_s3, %s2438_s2  ;;  %p2444_p3 = scmp.lt.s32.totalorder %s2438_s2, %s2438_s2 }
  0x29   :  { %p2445_p4 = por %p2444_p3, %p2443_p2 }
  0x2b   :  { %p2446_p5 = pnand %p2445_p4, %p2439_p1 }
  0x2d   :  { %2449 = shalt.err (!%p2446_p5)
}
  0x2e   :  { %65 = dma.hbm_to_vmem [thread:$0]  %s3203_s5, 64, %s63_s3, [#allocation13]  }
  0x2f   :  { %2470 = dma.done.wait [#allocation7], 512  }
  0x30   :  { %2471 = vsyncadd [#allocation7], 4294966784 }
  0x31   :  { %2472 = dma.done.wait [#allocation10], 4608  }
  0x32   :  { %2473 = vsyncadd [#allocation10], 4294962688 }
  0x33   :  { %2474 = dma.done.wait [#allocation13], 64  }
  0x34   :  { %2475 = vsyncadd [#allocation13], 4294967232  ;;  %v88_v0 = vld [vmem:[%s3204_s6] sm:$0xff]  ;;  %p2058_p6 = scmp.gt.s32.totalorder %s3198_s0, 0 }
  0x35   :  { %v90_v1 = vld [vmem:[%s3205_s7] sm:$0xff]  ;;  %89 = vst [vmem:[#allocation2] sm:$0xff] %v88_v0 }
  0x36   :  { %91 = vst [vmem:[#allocation3] sm:$0xff] %v90_v1  ;;  %96 = sbr.rel (%p2058_p6) target bundleno = 64 (0x40), region = 53 }
  0x3b   :  { %v2486_v2 = vmov 0.0  }
  0x3c   :  { %97 = vst [vmem:[#allocation14] sm:$0xff] %v2486_v2  ;;  %98 = vst [vmem:[#allocation14 + $0x8] sm:$0xff] %v2486_v2 }
  0x3d   :  { %99 = vst [vmem:[#allocation14 + $0x10] sm:$0xff] %v2486_v2  ;;  %100 = vst [vmem:[#allocation14 + $0x18] sm:$0xff] %v2486_v2 }
  0x3e   :  { %101 = vst [vmem:[#allocation14 + $0x20] sm:$0xff] %v2486_v2  ;;  %102 = vst [vmem:[#allocation14 + $0x28] sm:$0xff] %v2486_v2 }
  0x3f   :  { %103 = vst [vmem:[#allocation14 + $0x30] sm:$0xff] %v2486_v2  ;;  %104 = vst [vmem:[#allocation14 + $0x38] sm:$0xff] %v2486_v2 }
  0x40 PF:  { %p2060_p7 = scmp.le.s32.totalorder %s3198_s0, 0 }
  0x42   :  { %108 = sbr.rel (%p2060_p7) target bundleno = 2125 (0x84d), region = 57 }
  0x47   :  { %v2566_v3 = vld [vmem:[#allocation9 + $0x4] ss:$16 sps:$4 sm:$0xff]   ;;  %v2568_v4 = vld [vmem:[#allocation9 + $0xc] ss:$16 sps:$4 sm:$0xff]   ;;  %v3207_v5 = vmov 0   ;;  %vm191_vm0 = vcmask 130048   ;;  %v151_v57 = vlaneseq }
  0x48   :  { %227 = vmatprep.mubr.bf16.mxu0 %v3207_v5  ;;  %268 = vmatprep.mubr.bf16.mxu1 %v3207_v5  ;;  %v2573_v6 = vld [vmem:[#allocation9] ss:$16 sps:$4 sm:$0xff]   ;;  %v2575_v7 = vld [vmem:[#allocation9 + $0x8] ss:$16 sps:$4 sm:$0xff]   ;;  %v2579_v9 = vld [vmem:[#allocation11 + $0xe4] ss:$16 sps:$4 sm:$0xff]  }
  0x49   :  { %209 = vmatprep.subr.bf16.mxu0 %v2566_v3  ;;  %v149_v8 = vld [vmem:[#allocation6] sm:$0xf]  ;;  %2150 = vset.pattern.permute.xlu0 %v3207_v5  ;;  %v2584_v10 = vld [vmem:[#allocation11 + $0xec] ss:$16 sps:$4 sm:$0xff]   ;;  %v2589_v12 = vld [vmem:[#allocation11 + $0xe8] ss:$16 sps:$4 sm:$0xff]  }
  0x4a   :  { %250 = vmatprep.subr.bf16.mxu1 %v2568_v4  ;;  %2151 = vset.pattern.permute.xlu1 %v3207_v5  ;;  %v2587_v11 = vld [vmem:[#allocation11 + $0xe0] ss:$16 sps:$4 sm:$0xff]   ;;  %v2592_v13 = vld [vmem:[#allocation11 + $0xc4] ss:$16 sps:$4 sm:$0xff]   ;;  %v2596_v14 = vld [vmem:[#allocation11 + $0xcc] ss:$16 sps:$4 sm:$0xff]  }
  0x4b   :  { %210 = vmatpush1.bf16.msra.mxu0 %v2573_v6  ;;  %251 = vmatpush1.bf16.msra.mxu1 %v2575_v7  ;;  %v2598_v15 = vld [vmem:[#allocation11 + $0xc0] ss:$16 sps:$4 sm:$0xff]   ;;  %v2602_v16 = vld [vmem:[#allocation11 + $0xc8] ss:$16 sps:$4 sm:$0xff]   ;;  %v2606_v17 = vld [vmem:[#allocation11 + $0xa4] ss:$16 sps:$4 sm:$0xff]  }
  0x4c   :  { %438 = vmatprep.subr.bf16.mxu0 %v2579_v9  ;;  %479 = vmatprep.subr.bf16.mxu1 %v2584_v10  ;;  %v2608_v18 = vld [vmem:[#allocation11 + $0xac] ss:$16 sps:$4 sm:$0xff]   ;;  %v2612_v19 = vld [vmem:[#allocation11 + $0xa0] ss:$16 sps:$4 sm:$0xff]   ;;  %v2616_v20 = vld [vmem:[#allocation11 + $0xa8] ss:$16 sps:$4 sm:$0xff]  }
  0x4d   :  { %v2620_v21 = vld [vmem:[#allocation11 + $0x84] ss:$16 sps:$4 sm:$0xff]   ;;  %v2622_v22 = vld [vmem:[#allocation11 + $0x8c] ss:$16 sps:$4 sm:$0xff]   ;;  %v2624_v23 = vld [vmem:[#allocation11 + $0x80] ss:$16 sps:$4 sm:$0xff]  }
  0x4e   :  { %2065 = vmatmul.mubr.msk.bf16.vlgmr.msra.gmra.mxu0 %vm191_vm0, %v149_v8  ;;  %2066 = vmatmul.mubr.msk.bf16.vlgmr.msra.gmra.mxu1 %vm191_vm0, %v149_v8  ;;  %v2626_v24 = vld [vmem:[#allocation11 + $0x88] ss:$16 sps:$4 sm:$0xff]   ;;  %v2630_v25 = vld [vmem:[#allocation11 + $0x64] ss:$16 sps:$4 sm:$0xff]   ;;  %v2634_v26 = vld [vmem:[#allocation11 + $0x6c] ss:$16 sps:$4 sm:$0xff]  }
  0x4f   :  { %439 = vmatpush1.bf16.msra.mxu0 %v2587_v11  ;;  %480 = vmatpush1.bf16.msra.mxu1 %v2589_v12  ;;  %v2636_v27 = vld [vmem:[#allocation11 + $0x60] ss:$16 sps:$4 sm:$0xff]   ;;  %v2640_v28 = vld [vmem:[#allocation11 + $0x68] ss:$16 sps:$4 sm:$0xff]   ;;  %v2644_v29 = vld [vmem:[#allocation11 + $0x44] ss:$16 sps:$4 sm:$0xff]  }
  0x50   :  { %440 = vmatprep.subr.bf16.mxu0 %v2592_v13  ;;  %481 = vmatprep.subr.bf16.mxu1 %v2596_v14  ;;  %v2646_v30 = vld [vmem:[#allocation11 + $0x4c] ss:$16 sps:$4 sm:$0xff]   ;;  %v2650_v31 = vld [vmem:[#allocation11 + $0x40] ss:$16 sps:$4 sm:$0xff]   ;;  %v2652_v32 = vld [vmem:[#allocation11 + $0x48] ss:$16 sps:$4 sm:$0xff]  }
  0x51   :  { %470 = vmatprep.mubr.bf16.mxu0 %v3207_v5  ;;  %511 = vmatprep.mubr.bf16.mxu1 %v3207_v5  ;;  %v2657_v33 = vld [vmem:[%s3199_s1] sm:$0xff]  ;;  %v2663_v35 = vld [vmem:[#allocation11 + $0x2c] ss:$16 sps:$4 sm:$0xff]   ;;  %v2672_v38 = vld [vmem:[#allocation11 + $0x28] ss:$16 sps:$4 sm:$0xff]   ;;  %v152_v58 = vshrl.u32 %v151_v57, 7 }
  0x52   :  { %v2661_v34 = vld [vmem:[#allocation11 + $0x24] ss:$16 sps:$4 sm:$0xff]   ;;  %vm549_vm1 = vcmp.gt.s32.totalorder %v2657_v33, 0  ;;  %vm759_vm2 = vcmp.gt.s32.totalorder %v2657_v33, 1  ;;  %v2670_v37 = vld [vmem:[#allocation11 + $0x20] ss:$16 sps:$4 sm:$0xff]  }
  0x53   :  { %441 = vmatpush1.bf16.msra.mxu0 %v2598_v15  ;;  %482 = vmatpush1.bf16.msra.mxu1 %v2602_v16  ;;  %v550_v36 = vsel %vm549_vm1, 1, %v3207_v5  ;;  %v760_v39 = vsel %vm759_vm2, 1, %v3207_v5  ;;  %v2677_v40 = vld [vmem:[#allocation11 + $0x4] ss:$16 sps:$4 sm:$0xff]   ;;  %v2679_v41 = vld [vmem:[#allocation11 + $0xc] ss:$16 sps:$4 sm:$0xff]  }
  0x54   :  { %442 = vmatprep.subr.bf16.mxu0 %v2606_v17  ;;  %483 = vmatprep.subr.bf16.mxu1 %v2608_v18  ;;  %vm1392_vm3 = vcmp.gt.s32.totalorder %v2657_v33, 4  ;;  %v2684_v42 = vld [vmem:[#allocation11] ss:$16 sps:$4 sm:$0xff]   ;;  %v2686_v43 = vld [vmem:[#allocation11 + $0x8] ss:$16 sps:$4 sm:$0xff]   ;;  %vm1814_vm4 = vcmp.gt.s32.totalorder %v2657_v33, 6 }
  0x55   :  { %552 = vperm.xlu0 %2150, %v550_v36   ;;  %v2688_v44 = vld [vmem:[#allocation2] sm:$0xff]  ;;  %v1393_v45 = vsel %vm1392_vm3, 1, %v3207_v5  ;;  %v1815_v47 = vsel %vm1814_vm4, 1, %v3207_v5  ;;  %v560_v48 = vld [vmem:[#allocation6 + $0x4] sm:$0xf]  ;;  %v153_v59 = vsub.s32 0, %v152_v58 }
  0x56   :  { %v277_v46 = vpack.c.bf16 %v2688_v44, %v2688_v44  ;;  %v145_v60 = vld [vmem:[#allocation12] sm:$0xf]  ;;  %v157_v61 = vsub.s32 1, %v152_v58  ;;  %vm970_vm6 = vcmp.gt.s32.totalorder %v2657_v33, 2  ;;  %vm1181_vm7 = vcmp.gt.s32.totalorder %v2657_v33, 3 }
  0x57   :  { %443 = vmatpush1.bf16.msra.mxu0 %v2612_v19  ;;  %484 = vmatpush1.bf16.msra.mxu1 %v2616_v20  ;;  %v2743_v62 = vrot.slane %v145_v60, %v153_v59  ;;  %vm1603_vm8 = vcmp.gt.s32.totalorder %v2657_v33, 5  ;;  %vm2025_vm9 = vcmp.gt.s32.totalorder %v2657_v33, 7 }
  0x58   :  { %444 = vmatprep.subr.bf16.mxu0 %v2620_v21  ;;  %485 = vmatprep.subr.bf16.mxu1 %v2622_v22  ;;  %v2745_v63 = vrot.slane %v145_v60, %v157_v61 }
  0x59   :  { %762 = vperm.xlu0 %2150, %v760_v39   ;;  %v165_v39 = vsub.s32 3, %v152_v58 }
  0x5b   :  { %445 = vmatpush1.bf16.msra.mxu0 %v2624_v23  ;;  %486 = vmatpush1.bf16.msra.mxu1 %v2626_v24 }
  0x5c   :  { %446 = vmatprep.subr.bf16.mxu0 %v2630_v25  ;;  %487 = vmatprep.subr.bf16.mxu1 %v2634_v26 }
  0x5d   :  { %1395 = vperm.xlu0 %2150, %v1393_v45  }
  0x5f   :  { %447 = vmatpush1.bf16.msra.mxu0 %v2636_v27  ;;  %488 = vmatpush1.bf16.msra.mxu1 %v2640_v28 }
  0x60   :  { %448 = vmatprep.subr.bf16.mxu0 %v2644_v29  ;;  %489 = vmatprep.subr.bf16.mxu1 %v2646_v30 }
  0x61   :  { %1817 = vperm.xlu0 %2150, %v1815_v47  }
  0x63   :  { %449 = vmatpush1.bf16.msra.mxu0 %v2650_v31  ;;  %490 = vmatpush1.bf16.msra.mxu1 %v2652_v32 }
  0x64   :  { %450 = vmatprep.subr.bf16.mxu0 %v2661_v34  ;;  %491 = vmatprep.subr.bf16.mxu1 %v2663_v35 }
  0x67   :  { %451 = vmatpush1.bf16.msra.mxu0 %v2670_v37  ;;  %492 = vmatpush1.bf16.msra.mxu1 %v2672_v38 }
  0x68   :  { %452 = vmatprep.subr.bf16.mxu0 %v2677_v40  ;;  %493 = vmatprep.subr.bf16.mxu1 %v2679_v41 }
  0x6b   :  { %453 = vmatpush1.bf16.msra.mxu0 %v2684_v42  ;;  %494 = vmatpush1.bf16.msra.mxu1 %v2686_v43 }
  0x6c   :  { %578 = vmatprep.subr.bf16.mxu0 %v2566_v3  ;;  %619 = vmatprep.subr.bf16.mxu1 %v2568_v4 }
  0x6e   :  { %471 = vmatmul.mubr.bf16.vlgmr.msra.gmra.mxu0 %v277_v46  ;;  %512 = vmatmul.mubr.bf16.vlgmr.msra.gmra.mxu1 %v277_v46 }
  0x6f   :  { %579 = vmatpush1.bf16.msra.mxu0 %v2573_v6  ;;  %596 = vmatprep.mubr.bf16.mxu0 %v3207_v5 }
  0x70   :  { %620 = vmatpush1.bf16.msra.mxu1 %v2575_v7  ;;  %637 = vmatprep.mubr.bf16.mxu1 %v3207_v5 }
  0x71   :  { %647 = vmatprep.subr.bf16.mxu0 %v2579_v9  ;;  %688 = vmatprep.subr.bf16.mxu1 %v2584_v10 }
  0x76   :  { %2102 = vmatmul.mubr.msk.bf16.vlgmr.msra.gmra.mxu0 %vm191_vm0, %v560_v48  ;;  %2103 = vmatmul.mubr.msk.bf16.vlgmr.msra.gmra.mxu1 %vm191_vm0, %v560_v48 }
  0x77   :  { %648 = vmatpush1.bf16.msra.mxu0 %v2587_v11  ;;  %689 = vmatpush1.bf16.msra.mxu1 %v2589_v12 }
  0x78   :  { %649 = vmatprep.subr.bf16.mxu0 %v2592_v13  ;;  %690 = vmatprep.subr.bf16.mxu1 %v2596_v14 }
  0x79   :  { %679 = vmatprep.mubr.bf16.mxu0 %v3207_v5  ;;  %720 = vmatprep.mubr.bf16.mxu1 %v3207_v5 }
  0x7b   :  { %650 = vmatpush1.bf16.msra.mxu0 %v2598_v15  ;;  %691 = vmatpush1.bf16.msra.mxu1 %v2602_v16 }
  0x7c   :  { %651 = vmatprep.subr.bf16.mxu0 %v2606_v17  ;;  %692 = vmatprep.subr.bf16.mxu1 %v2608_v18 }
  0x7f   :  { %652 = vmatpush1.bf16.msra.mxu0 %v2612_v19  ;;  %693 = vmatpush1.bf16.msra.mxu1 %v2616_v20 }
  0x80   :  { %653 = vmatprep.subr.bf16.mxu0 %v2620_v21  ;;  %694 = vmatprep.subr.bf16.mxu1 %v2622_v22 }
  0x83   :  { %654 = vmatpush1.bf16.msra.mxu0 %v2624_v23  ;;  %695 = vmatpush1.bf16.msra.mxu1 %v2626_v24 }
  0x84   :  { %655 = vmatprep.subr.bf16.mxu0 %v2630_v25  ;;  %696 = vmatprep.subr.bf16.mxu1 %v2634_v26 }
  0x87   :  { %656 = vmatpush1.bf16.msra.mxu0 %v2636_v27  ;;  %697 = vmatpush1.bf16.msra.mxu1 %v2640_v28 }
  0x88   :  { %657 = vmatprep.subr.bf16.mxu0 %v2644_v29  ;;  %698 = vmatprep.subr.bf16.mxu1 %v2646_v30 }
  0x8b   :  { %658 = vmatpush1.bf16.msra.mxu0 %v2650_v31  ;;  %699 = vmatpush1.bf16.msra.mxu1 %v2652_v32 }
  0x8c   :  { %659 = vmatprep.subr.bf16.mxu0 %v2661_v34  ;;  %700 = vmatprep.subr.bf16.mxu1 %v2663_v35 }
  0x8f   :  { %660 = vmatpush1.bf16.msra.mxu0 %v2670_v37  ;;  %701 = vmatpush1.bf16.msra.mxu1 %v2672_v38 }
  0x90   :  { %661 = vmatprep.subr.bf16.mxu0 %v2677_v40  ;;  %702 = vmatprep.subr.bf16.mxu1 %v2679_v41 }
  0x93   :  { %662 = vmatpush1.bf16.msra.mxu0 %v2684_v42  ;;  %703 = vmatpush1.bf16.msra.mxu1 %v2686_v43 }
  0x94   :  { %789 = vmatprep.subr.bf16.mxu0 %v2566_v3  ;;  %830 = vmatprep.subr.bf16.mxu1 %v2568_v4 }
 0x10e   :  { %v229_v49 = vpop.f32.mrf.mxu0  ;;  %v270_v50 = vpop.f32.mrf.mxu1 }
 0x10f   :  { %v230_v0 = vadd.f32 %v229_v49, %v2743_v62  ;;  %v161_v49 = vsub.s32 2, %v152_v58  ;;  %v148_v58 = vld [vmem:[#allocation3] sm:$0xff] }
 0x110   :  { %v231_v51 = vpop.f32.mrf.mxu0  ;;  %v272_v52 = vpop.f32.mrf.mxu1 }
 0x111   :  { %v232_v8 = vadd.f32 %v231_v51, %v2745_v63  ;;  %v2752_v5 = vrot.slane %v145_v60, %v161_v49 }
 0x112   :  { %v233_v53 = vpop.f32.mrf.mxu0  ;;  %v274_v54 = vpop.f32.mrf.mxu1 }
 0x114   :  { %v234_v55 = vpop.f32.mrf.mxu0  ;;  %v275_v56 = vpop.f32.mrf.mxu1 }
 0x115   :  { %v2749_v56 = vrot.slane %v145_v60, %v165_v39 }
 0x117   :  { %v273_v61 = vadd.f32 %v272_v52, %v2749_v56  ;;  %v553_v52 = vpop.permute.xlu0 %552 }
 0x118   :  { %vm554_vm5 = vcmp.eq.s32.totalorder %v553_v52, 1 }
 0x12e   :  { %v472_v1 = vpop.f32.mrf.mxu0  ;;  %v513_v2 = vpop.f32.mrf.mxu1 }
 0x12f   :  { %v520_v36 = vadd.f32 %v472_v1, %v230_v0  ;;  %v271_v0 = vadd.f32 %v270_v50, %v2752_v5 }
 0x130   :  { %v474_v45 = vpop.f32.mrf.mxu0  ;;  %v515_v46 = vpop.f32.mrf.mxu1 }
 0x131   :  { %v2099_v47 = vmul.f32 -1.442695, %v520_v36  ;;  %v521_v48 = vadd.f32 %v474_v45, %v232_v8  ;;  %v523_v51 = vadd.f32 %v515_v46, %v273_v61  ;;  %v522_v8 = vadd.f32 %v513_v2, %v271_v0 }
 0x132   :  { %v476_v53 = vpop.f32.mrf.mxu0  ;;  %v517_v54 = vpop.f32.mrf.mxu1 }
 0x133   :  { %2206 = vpow2.f32 %v2099_v47  ;;  %v2100_v55 = vmul.f32 -1.442695, %v521_v48  ;;  %v2101_v1 = vmul.f32 -1.442695, %v523_v51 }
 0x134   :  { %v477_v57 = vpop.f32.mrf.mxu0  ;;  %v518_v59 = vpop.f32.mrf.mxu1 }
 0x135   :  { %2208 = vpow2.f32 %v2100_v55 }
 0x136   :  { %2210 = vpow2.f32 %v2101_v1 }
 0x140   :  { %v2207_v36 = vpop.eup %2206 }
 0x141   :  { %v527_v45 = vadd.f32 1.0, %v2207_v36  ;;  %v3209_v36 = vmov 0  }
 0x142   :  { %v2209_v53 = vpop.eup %2208  ;;  %v971_v52 = vsel %vm970_vm6, 1, %v3209_v36 }
 0x143   :  { %2212 = vrcp.f32 %v527_v45  ;;  %v533_v39 = vadd.f32 1.0, %v2209_v53  ;;  %v2211_v47 = vpop.eup %2210  ;;  %973 = vperm.xlu1 %2151, %v971_v52  }
 0x144   :  { %2214 = vtanh.f32 %v522_v8  ;;  %v540_v55 = vadd.f32 1.0, %v2211_v47  ;;  %v2768_v8 = vpop.f32.mrf.mxu1 }
 0x145   :  { %2216 = vrcp.f32 %v533_v39 }
 0x146   :  { %2218 = vrcp.f32 %v540_v55  ;;  %v2770_v53 = vpop.f32.mrf.mxu1  ;;  %v1604_v55 = vsel %vm1603_vm8, 1, %v3209_v36 }
 0x148   :  { %v643_v47 = vpop.f32.mrf.mxu1 }
 0x150   :  { %v2213_v48 = vpop.eup %2212 }
 0x151   :  { %v2215_v54 = vpop.eup %2214 }
 0x152   :  { %v2217_v60 = vpop.eup %2216  ;;  %v544_v57 = vmul.f32 %v2215_v54, %v2213_v48  ;;  %v771_v54 = vld [vmem:[#allocation6 + $0x8] sm:$0xf] }
 0x153   :  { %v543_v46 = vmul.f32 %v2217_v60, %v148_v58  ;;  %v2219_v59 = vpop.eup %2218  ;;  %v1182_v60 = vsel %vm1181_vm7, 1, %v3209_v36 }
 0x154   :  { %1184 = vperm.xlu1 %2151, %v1182_v60   ;;  %v642_v60 = vadd.f32 %v2770_v53, %v2749_v56 }
 0x155   :  { %v545_v50 = vadd.f32 %v544_v57, %v543_v46  ;;  %v2026_v46 = vsel %vm2025_vm9, 1, %v3209_v36 }
 0x157   :  { %2220 = vtanh.f32 %v545_v50  ;;  %v2755_v2 = vsel %vm554_vm5, %v545_v50, %v148_v58  ;;  %v644_v58 = vpop.f32.mrf.mxu1 }
 0x158   :  { %1606 = vperm.xlu1 %2151, %v1604_v55   ;;  %v640_v55 = vadd.f32 %v2768_v8, %v2752_v5 }
 0x15c   :  { %2028 = vperm.xlu1 %2151, %v2026_v46  }
 0x164   :  { %v2221_v49 = vpop.eup %2220 }
 0x165   :  { %v547_v61 = vmul.f32 %v2221_v49, %v2219_v59 }
 0x167   :  { %v2758_v51 = vsel %vm554_vm5, %v547_v61, %v2688_v44  ;;  %v557_v0 = vsel %vm554_vm5, %v547_v61, 0.0  ;;  %v598_v44 = vpop.f32.mrf.mxu0 }
 0x168   :  { %558 = vst [vmem:[#allocation14] sm:$0xff] %v557_v0  ;;  %v646_v1 = vpack.c.bf16 %v2758_v51, %v2758_v51  ;;  %v599_v57 = vadd.f32 %v598_v44, %v2743_v62 }
 0x169   :  { %v600_v45 = vpop.f32.mrf.mxu0 }
 0x16a   :  { %680 = vmatmul.mubr.bf16.vlgmr.msra.gmra.mxu0 %v646_v1  ;;  %721 = vmatmul.mubr.bf16.vlgmr.msra.gmra.mxu1 %v646_v1  ;;  %v601_v49 = vadd.f32 %v600_v45, %v2745_v63 }
 0x16b   :  { %790 = vmatpush1.bf16.msra.mxu0 %v2573_v6  ;;  %807 = vmatprep.mubr.bf16.mxu0 %v3209_v36  ;;  %v602_v39 = vpop.f32.mrf.mxu0 }
 0x16c   :  { %831 = vmatpush1.bf16.msra.mxu1 %v2575_v7  ;;  %848 = vmatprep.mubr.bf16.mxu1 %v3209_v36 }
 0x16d   :  { %858 = vmatprep.subr.bf16.mxu0 %v2579_v9  ;;  %899 = vmatprep.subr.bf16.mxu1 %v2584_v10  ;;  %v603_v48 = vpop.f32.mrf.mxu0 }
 0x172   :  { %2107 = vmatmul.mubr.msk.bf16.vlgmr.msra.gmra.mxu0 %vm191_vm0, %v771_v54  ;;  %2108 = vmatmul.mubr.msk.bf16.vlgmr.msra.gmra.mxu1 %vm191_vm0, %v771_v54 }
 0x173   :  { %859 = vmatpush1.bf16.msra.mxu0 %v2587_v11  ;;  %900 = vmatpush1.bf16.msra.mxu1 %v2589_v12 }
 0x174   :  { %860 = vmatprep.subr.bf16.mxu0 %v2592_v13  ;;  %901 = vmatprep.subr.bf16.mxu1 %v2596_v14 }
 0x175   :  { %890 = vmatprep.mubr.bf16.mxu0 %v3209_v36  ;;  %931 = vmatprep.mubr.bf16.mxu1 %v3209_v36 }
 0x177   :  { %861 = vmatpush1.bf16.msra.mxu0 %v2598_v15  ;;  %902 = vmatpush1.bf16.msra.mxu1 %v2602_v16 }
 0x178   :  { %862 = vmatprep.subr.bf16.mxu0 %v2606_v17  ;;  %903 = vmatprep.subr.bf16.mxu1 %v2608_v18 }
 0x17b   :  { %863 = vmatpush1.bf16.msra.mxu0 %v2612_v19  ;;  %904 = vmatpush1.bf16.msra.mxu1 %v2616_v20 }
 0x17c   :  { %864 = vmatprep.subr.bf16.mxu0 %v2620_v21  ;;  %905 = vmatprep.subr.bf16.mxu1 %v2622_v22 }
 0x17f   :  { %865 = vmatpush1.bf16.msra.mxu0 %v2624_v23  ;;  %906 = vmatpush1.bf16.msra.mxu1 %v2626_v24 }
 0x180   :  { %866 = vmatprep.subr.bf16.mxu0 %v2630_v25  ;;  %907 = vmatprep.subr.bf16.mxu1 %v2634_v26 }
 0x183   :  { %867 = vmatpush1.bf16.msra.mxu0 %v2636_v27  ;;  %908 = vmatpush1.bf16.msra.mxu1 %v2640_v28 }
 0x184   :  { %868 = vmatprep.subr.bf16.mxu0 %v2644_v29  ;;  %909 = vmatprep.subr.bf16.mxu1 %v2646_v30 }
 0x187   :  { %869 = vmatpush1.bf16.msra.mxu0 %v2650_v31  ;;  %910 = vmatpush1.bf16.msra.mxu1 %v2652_v32 }
 0x188   :  { %870 = vmatprep.subr.bf16.mxu0 %v2661_v34  ;;  %911 = vmatprep.subr.bf16.mxu1 %v2663_v35 }
 0x18b   :  { %871 = vmatpush1.bf16.msra.mxu0 %v2670_v37  ;;  %912 = vmatpush1.bf16.msra.mxu1 %v2672_v38 }
 0x18c   :  { %872 = vmatprep.subr.bf16.mxu0 %v2677_v40  ;;  %913 = vmatprep.subr.bf16.mxu1 %v2679_v41 }
 0x18f   :  { %873 = vmatpush1.bf16.msra.mxu0 %v2684_v42  ;;  %914 = vmatpush1.bf16.msra.mxu1 %v2686_v43 }
 0x190   :  { %1000 = vmatprep.subr.bf16.mxu0 %v2566_v3  ;;  %1041 = vmatprep.subr.bf16.mxu1 %v2568_v4 }
 0x22a   :  { %v681_v50 = vpop.f32.mrf.mxu0  ;;  %v722_v59 = vpop.f32.mrf.mxu1 }
 0x22b   :  { %v729_v61 = vadd.f32 %v681_v50, %v599_v57  ;;  %v731_v45 = vadd.f32 %v722_v59, %v640_v55 }
 0x22c   :  { %v683_v0 = vpop.f32.mrf.mxu0  ;;  %v724_v1 = vpop.f32.mrf.mxu1 }
 0x22d   :  { %v2104_v39 = vmul.f32 -1.442695, %v729_v61  ;;  %v730_v47 = vadd.f32 %v683_v0, %v601_v49  ;;  %v732_v44 = vadd.f32 %v724_v1, %v642_v60 }
 0x22e   :  { %v685_v48 = vpop.f32.mrf.mxu0  ;;  %v726_v58 = vpop.f32.mrf.mxu1 }
 0x22f   :  { %2222 = vpow2.f32 %v2104_v39  ;;  %v2105_v54 = vmul.f32 -1.442695, %v730_v47  ;;  %v2106_v46 = vmul.f32 -1.442695, %v732_v44 }
 0x230   :  { %v686_v33 = vpop.f32.mrf.mxu0  ;;  %v727_v52 = vpop.f32.mrf.mxu1 }
 0x231   :  { %2224 = vpow2.f32 %v2105_v54  ;;  %v763_v54 = vpop.permute.xlu0 %762 }
 0x232   :  { %2226 = vtanh.f32 %v731_v45  ;;  %vm764_vm10 = vcmp.eq.s32.totalorder %v763_v54, 1 }
 0x233   :  { %2228 = vpow2.f32 %v2106_v46 }
 0x23c   :  { %v2223_v57 = vpop.eup %2222 }
 0x23d   :  { %v736_v50 = vadd.f32 1.0, %v2223_v57 }
 0x23e   :  { %v2225_v49 = vpop.eup %2224 }
 0x23f   :  { %2230 = vrcp.f32 %v736_v50  ;;  %v742_v61 = vadd.f32 1.0, %v2225_v49  ;;  %v2227_v0 = vpop.eup %2226 }
 0x240   :  { %v2229_v39 = vpop.eup %2228 }
 0x241   :  { %2232 = vrcp.f32 %v742_v61  ;;  %v749_v53 = vadd.f32 1.0, %v2229_v39  ;;  %v982_v39 = vld [vmem:[#allocation6 + $0xc] sm:$0xf] }
 0x243   :  { %2234 = vrcp.f32 %v749_v53 }
 0x24c   :  { %v2231_v47 = vpop.eup %2230 }
 0x24d   :  { %v753_v48 = vmul.f32 %v2231_v47, %v2227_v0 }
 0x24e   :  { %v2233_v58 = vpop.eup %2232 }
 0x24f   :  { %v752_v1 = vmul.f32 %v2233_v58, %v2755_v2 }
 0x250   :  { %v2235_v33 = vpop.eup %2234 }
 0x251   :  { %v754_v8 = vadd.f32 %v753_v48, %v752_v1 }
 0x253   :  { %2236 = vtanh.f32 %v754_v8  ;;  %v2824_v59 = vsel %vm764_vm10, %v754_v8, %v2755_v2  ;;  %v809_v2 = vpop.f32.mrf.mxu0 }
 0x254   :  { %v810_v47 = vadd.f32 %v809_v2, %v2743_v62 }
 0x255   :  { %v811_v46 = vpop.f32.mrf.mxu0 }
 0x256   :  { %v812_v53 = vadd.f32 %v811_v46, %v2745_v63 }
 0x257   :  { %v813_v50 = vpop.f32.mrf.mxu0 }
 0x259   :  { %v814_v61 = vpop.f32.mrf.mxu0 }
 0x260   :  { %v2237_v52 = vpop.eup %2236 }
 0x261   :  { %v756_v60 = vmul.f32 %v2237_v52, %v2235_v33 }
 0x263   :  { %v2827_v44 = vsel %vm764_vm10, %v756_v60, %v2758_v51  ;;  %v767_v55 = vsel %vm764_vm10, %v756_v60, 0.0  ;;  %v850_v51 = vpop.f32.mrf.mxu1 }
 0x264   :  { %769 = vst [vmem:[#allocation14 + $0x8] sm:$0xff] %v767_v55  ;;  %v857_v45 = vpack.c.bf16 %v2827_v44, %v2827_v44  ;;  %v851_v2 = vadd.f32 %v850_v51, %v2752_v5 }
 0x265   :  { %v852_v57 = vpop.f32.mrf.mxu1 }
 0x266   :  { %891 = vmatmul.mubr.bf16.vlgmr.msra.gmra.mxu0 %v857_v45  ;;  %932 = vmatmul.mubr.bf16.vlgmr.msra.gmra.mxu1 %v857_v45 }
 0x267   :  { %1001 = vmatpush1.bf16.msra.mxu0 %v2573_v6  ;;  %1018 = vmatprep.mubr.bf16.mxu0 %v3209_v36  ;;  %v854_v49 = vpop.f32.mrf.mxu1 }
 0x268   :  { %1042 = vmatpush1.bf16.msra.mxu1 %v2575_v7  ;;  %1059 = vmatprep.mubr.bf16.mxu1 %v3209_v36 }
 0x269   :  { %1069 = vmatprep.subr.bf16.mxu0 %v2579_v9  ;;  %1110 = vmatprep.subr.bf16.mxu1 %v2584_v10  ;;  %v855_v0 = vpop.f32.mrf.mxu1 }
 0x26e   :  { %2112 = vmatmul.mubr.msk.bf16.vlgmr.msra.gmra.mxu0 %vm191_vm0, %v982_v39  ;;  %2113 = vmatmul.mubr.msk.bf16.vlgmr.msra.gmra.mxu1 %vm191_vm0, %v982_v39 }
 0x26f   :  { %1070 = vmatpush1.bf16.msra.mxu0 %v2587_v11  ;;  %1111 = vmatpush1.bf16.msra.mxu1 %v2589_v12 }
 0x270   :  { %1071 = vmatprep.subr.bf16.mxu0 %v2592_v13  ;;  %1112 = vmatprep.subr.bf16.mxu1 %v2596_v14 }
 0x271   :  { %1101 = vmatprep.mubr.bf16.mxu0 %v3209_v36  ;;  %1142 = vmatprep.mubr.bf16.mxu1 %v3209_v36 }
 0x273   :  { %1072 = vmatpush1.bf16.msra.mxu0 %v2598_v15  ;;  %1113 = vmatpush1.bf16.msra.mxu1 %v2602_v16 }
 0x274   :  { %1073 = vmatprep.subr.bf16.mxu0 %v2606_v17  ;;  %1114 = vmatprep.subr.bf16.mxu1 %v2608_v18 }
 0x277   :  { %1074 = vmatpush1.bf16.msra.mxu0 %v2612_v19  ;;  %1115 = vmatpush1.bf16.msra.mxu1 %v2616_v20 }
 0x278   :  { %1075 = vmatprep.subr.bf16.mxu0 %v2620_v21  ;;  %1116 = vmatprep.subr.bf16.mxu1 %v2622_v22 }
 0x27b   :  { %1076 = vmatpush1.bf16.msra.mxu0 %v2624_v23  ;;  %1117 = vmatpush1.bf16.msra.mxu1 %v2626_v24 }
 0x27c   :  { %1077 = vmatprep.subr.bf16.mxu0 %v2630_v25  ;;  %1118 = vmatprep.subr.bf16.mxu1 %v2634_v26 }
 0x27f   :  { %1078 = vmatpush1.bf16.msra.mxu0 %v2636_v27  ;;  %1119 = vmatpush1.bf16.msra.mxu1 %v2640_v28 }
 0x280   :  { %1079 = vmatprep.subr.bf16.mxu0 %v2644_v29  ;;  %1120 = vmatprep.subr.bf16.mxu1 %v2646_v30 }
 0x283   :  { %1080 = vmatpush1.bf16.msra.mxu0 %v2650_v31  ;;  %1121 = vmatpush1.bf16.msra.mxu1 %v2652_v32 }
 0x284   :  { %1081 = vmatprep.subr.bf16.mxu0 %v2661_v34  ;;  %1122 = vmatprep.subr.bf16.mxu1 %v2663_v35 }
 0x287   :  { %1082 = vmatpush1.bf16.msra.mxu0 %v2670_v37  ;;  %1123 = vmatpush1.bf16.msra.mxu1 %v2672_v38 }
 0x288   :  { %1083 = vmatprep.subr.bf16.mxu0 %v2677_v40  ;;  %1124 = vmatprep.subr.bf16.mxu1 %v2679_v41 }
 0x28b   :  { %1084 = vmatpush1.bf16.msra.mxu0 %v2684_v42  ;;  %1125 = vmatpush1.bf16.msra.mxu1 %v2686_v43 }
 0x28c   :  { %1211 = vmatprep.subr.bf16.mxu0 %v2566_v3  ;;  %1252 = vmatprep.subr.bf16.mxu1 %v2568_v4  ;;  %v853_v3 = vadd.f32 %v852_v57, %v2749_v56 }
 0x326   :  { %v892_v48 = vpop.f32.mrf.mxu0  ;;  %v933_v58 = vpop.f32.mrf.mxu1 }
 0x327   :  { %v940_v1 = vadd.f32 %v892_v48, %v810_v47  ;;  %v942_v61 = vadd.f32 %v933_v58, %v851_v2 }
 0x328   :  { %v894_v54 = vpop.f32.mrf.mxu0  ;;  %v935_v8 = vpop.f32.mrf.mxu1 }
 0x329   :  { %v2109_v33 = vmul.f32 -1.442695, %v940_v1  ;;  %v941_v52 = vadd.f32 %v894_v54, %v812_v53  ;;  %v943_v4 = vadd.f32 %v935_v8, %v853_v3 }
 0x32a   :  { %v896_v60 = vpop.f32.mrf.mxu0  ;;  %v937_v55 = vpop.f32.mrf.mxu1 }
 0x32b   :  { %2238 = vpow2.f32 %v2109_v33  ;;  %v2110_v45 = vmul.f32 -1.442695, %v941_v52  ;;  %v2111_v0 = vmul.f32 -1.442695, %v943_v4  ;;  %v974_v33 = vpop.permute.xlu1 %973 }
 0x32c   :  { %v897_v50 = vpop.f32.mrf.mxu0  ;;  %v938_v49 = vpop.f32.mrf.mxu1  ;;  %vm975_vm11 = vcmp.eq.s32.totalorder %v974_v33, 1 }
 0x32d   :  { %2240 = vpow2.f32 %v2110_v45 }
 0x32e   :  { %2242 = vtanh.f32 %v942_v61 }
 0x32f   :  { %2244 = vpow2.f32 %v2111_v0 }
 0x338   :  { %v2239_v46 = vpop.eup %2238 }
 0x339   :  { %v947_v39 = vadd.f32 1.0, %v2239_v46 }
 0x33a   :  { %v2241_v47 = vpop.eup %2240 }
 0x33b   :  { %2246 = vrcp.f32 %v947_v39  ;;  %v953_v48 = vadd.f32 1.0, %v2241_v47  ;;  %v2243_v53 = vpop.eup %2242 }
 0x33c   :  { %v2245_v1 = vpop.eup %2244 }
 0x33d   :  { %2248 = vrcp.f32 %v953_v48  ;;  %v960_v57 = vadd.f32 1.0, %v2245_v1 }
 0x33f   :  { %2250 = vrcp.f32 %v960_v57  ;;  %v1185_v57 = vpop.permute.xlu1 %1184 }
 0x340   :  { %vm1186_vm12 = vcmp.eq.s32.totalorder %v1185_v57, 1 }
 0x348   :  { %v2247_v54 = vpop.eup %2246 }
 0x349   :  { %v964_v52 = vmul.f32 %v2247_v54, %v2243_v53 }
 0x34a   :  { %v2249_v60 = vpop.eup %2248 }
 0x34b   :  { %v963_v8 = vmul.f32 %v2249_v60, %v2824_v59 }
 0x34c   :  { %v2251_v55 = vpop.eup %2250 }
 0x34d   :  { %v965_v51 = vadd.f32 %v964_v52, %v963_v8 }
 0x34f   :  { %2252 = vtanh.f32 %v965_v51  ;;  %v2879_v58 = vsel %vm975_vm11, %v965_v51, %v2824_v59  ;;  %v1020_v59 = vpop.f32.mrf.mxu0 }
 0x351   :  { %v1022_v2 = vpop.f32.mrf.mxu0 }
 0x353   :  { %v1024_v0 = vpop.f32.mrf.mxu0 }
 0x355   :  { %v1025_v39 = vpop.f32.mrf.mxu0 }
 0x35c   :  { %v2253_v45 = vpop.eup %2252 }
 0x35d   :  { %v967_v50 = vmul.f32 %v2253_v45, %v2251_v55 }
 0x35f   :  { %v2882_v49 = vsel %vm975_vm11, %v967_v50, %v2827_v44  ;;  %v978_v3 = vsel %vm975_vm11, %v967_v50, 0.0  ;;  %v2892_v44 = vpop.f32.mrf.mxu1 }
 0x360   :  { %980 = vst [vmem:[#allocation14 + $0x10] sm:$0xff] %v978_v3  ;;  %v1068_v4 = vpack.c.bf16 %v2882_v49, %v2882_v49 }
 0x361   :  { %v1063_v61 = vpop.f32.mrf.mxu1 }
 0x362   :  { %1102 = vmatmul.mubr.bf16.vlgmr.msra.gmra.mxu0 %v1068_v4  ;;  %1143 = vmatmul.mubr.bf16.vlgmr.msra.gmra.mxu1 %v1068_v4 }
 0x363   :  { %1212 = vmatpush1.bf16.msra.mxu0 %v2573_v6  ;;  %1229 = vmatprep.mubr.bf16.mxu0 %v3209_v36  ;;  %v1065_v46 = vpop.f32.mrf.mxu1  ;;  %v1193_v6 = vld [vmem:[#allocation6 + $0x10] sm:$0xf] }
 0x364   :  { %1253 = vmatpush1.bf16.msra.mxu1 %v2575_v7  ;;  %1270 = vmatprep.mubr.bf16.mxu1 %v3209_v36  ;;  %v2928_v7 = vld [vmem:[#allocation9 + $0x4] ss:$16 sps:$4 sm:$0xff]  }
 0x365   :  { %1280 = vmatprep.subr.bf16.mxu0 %v2579_v9  ;;  %1321 = vmatprep.subr.bf16.mxu1 %v2584_v10  ;;  %v1066_v47 = vpop.f32.mrf.mxu1  ;;  %v2931_v9 = vld [vmem:[#allocation9 + $0xc] ss:$16 sps:$4 sm:$0xff]   ;;  %v1021_v10 = vadd.f32 %v1020_v59, %v2743_v62 }
 0x36a   :  { %2117 = vmatmul.mubr.msk.bf16.vlgmr.msra.gmra.mxu0 %vm191_vm0, %v1193_v6  ;;  %2118 = vmatmul.mubr.msk.bf16.vlgmr.msra.gmra.mxu1 %vm191_vm0, %v1193_v6 }
 0x36b   :  { %1281 = vmatpush1.bf16.msra.mxu0 %v2587_v11  ;;  %1322 = vmatpush1.bf16.msra.mxu1 %v2589_v12 }
 0x36c   :  { %1282 = vmatprep.subr.bf16.mxu0 %v2592_v13  ;;  %1323 = vmatprep.subr.bf16.mxu1 %v2596_v14  ;;  %v1023_v13 = vadd.f32 %v1022_v2, %v2745_v63  ;;  %v2959_v2 = vld [vmem:[#allocation11 + $0xec] ss:$16 sps:$4 sm:$0xff]  }
 0x36d   :  { %1312 = vmatprep.mubr.bf16.mxu0 %v3209_v36  ;;  %1353 = vmatprep.mubr.bf16.mxu1 %v3209_v36 }
 0x36f   :  { %1283 = vmatpush1.bf16.msra.mxu0 %v2598_v15  ;;  %1324 = vmatpush1.bf16.msra.mxu1 %v2602_v16 }
 0x370   :  { %1284 = vmatprep.subr.bf16.mxu0 %v2606_v17  ;;  %1325 = vmatprep.subr.bf16.mxu1 %v2608_v18 }
 0x373   :  { %1285 = vmatpush1.bf16.msra.mxu0 %v2612_v19  ;;  %1326 = vmatpush1.bf16.msra.mxu1 %v2616_v20 }
 0x374   :  { %1286 = vmatprep.subr.bf16.mxu0 %v2620_v21  ;;  %1327 = vmatprep.subr.bf16.mxu1 %v2622_v22 }
 0x377   :  { %1287 = vmatpush1.bf16.msra.mxu0 %v2624_v23  ;;  %1328 = vmatpush1.bf16.msra.mxu1 %v2626_v24  ;;  %v1064_v24 = vadd.f32 %v1063_v61, %v2749_v56 }
 0x378   :  { %1288 = vmatprep.subr.bf16.mxu0 %v2630_v25  ;;  %1329 = vmatprep.subr.bf16.mxu1 %v2634_v26  ;;  %v1062_v26 = vadd.f32 %v2892_v44, %v2752_v5  ;;  %v2948_v44 = vld [vmem:[#allocation9] ss:$16 sps:$4 sm:$0xff]  }
 0x37b   :  { %1289 = vmatpush1.bf16.msra.mxu0 %v2636_v27  ;;  %1330 = vmatpush1.bf16.msra.mxu1 %v2640_v28 }
 0x37c   :  { %1290 = vmatprep.subr.bf16.mxu0 %v2644_v29  ;;  %1331 = vmatprep.subr.bf16.mxu1 %v2646_v30 }
 0x37f   :  { %1291 = vmatpush1.bf16.msra.mxu0 %v2650_v31  ;;  %1332 = vmatpush1.bf16.msra.mxu1 %v2652_v32 }
 0x380   :  { %1292 = vmatprep.subr.bf16.mxu0 %v2661_v34  ;;  %1333 = vmatprep.subr.bf16.mxu1 %v2663_v35 }
 0x383   :  { %1293 = vmatpush1.bf16.msra.mxu0 %v2670_v37  ;;  %1334 = vmatpush1.bf16.msra.mxu1 %v2672_v38 }
 0x384   :  { %1294 = vmatprep.subr.bf16.mxu0 %v2677_v40  ;;  %1335 = vmatprep.subr.bf16.mxu1 %v2679_v41 }
 0x387   :  { %1295 = vmatpush1.bf16.msra.mxu0 %v2684_v42  ;;  %1336 = vmatpush1.bf16.msra.mxu1 %v2686_v43 }
 0x388   :  { %1422 = vmatprep.subr.bf16.mxu0 %v2928_v7  ;;  %1463 = vmatprep.subr.bf16.mxu1 %v2931_v9 }
 0x422   :  { %v1103_v11 = vpop.f32.mrf.mxu0  ;;  %v1144_v12 = vpop.f32.mrf.mxu1 }
 0x423   :  { %v1151_v14 = vadd.f32 %v1103_v11, %v1021_v10  ;;  %v1153_v27 = vadd.f32 %v1144_v12, %v1062_v26  ;;  %v1404_v12 = vld [vmem:[#allocation6 + $0x14] sm:$0xf]  ;;  %v3013_v26 = vld [vmem:[#allocation11 + $0x88] ss:$16 sps:$4 sm:$0xff]  }
 0x424   :  { %v1105_v15 = vpop.f32.mrf.mxu0  ;;  %v1146_v16 = vpop.f32.mrf.mxu1 }
 0x425   :  { %v2114_v17 = vmul.f32 -1.442695, %v1151_v14  ;;  %v1152_v18 = vadd.f32 %v1105_v15, %v1023_v13  ;;  %v1154_v25 = vadd.f32 %v1146_v16, %v1064_v24  ;;  %v2972_v13 = vld [vmem:[#allocation11 + $0xe0] ss:$16 sps:$4 sm:$0xff]   ;;  %v2975_v14 = vld [vmem:[#allocation11 + $0xe8] ss:$16 sps:$4 sm:$0xff]  }
 0x426   :  { %v1107_v19 = vpop.f32.mrf.mxu0  ;;  %v1148_v20 = vpop.f32.mrf.mxu1  ;;  %v2978_v15 = vld [vmem:[#allocation11 + $0xc4] ss:$16 sps:$4 sm:$0xff]   ;;  %v2981_v16 = vld [vmem:[#allocation11 + $0xcc] ss:$16 sps:$4 sm:$0xff]  }
 0x427   :  { %2254 = vpow2.f32 %v2114_v17  ;;  %v2115_v21 = vmul.f32 -1.442695, %v1152_v18  ;;  %v2116_v28 = vmul.f32 -1.442695, %v1154_v25  ;;  %v2986_v17 = vld [vmem:[#allocation11 + $0xc0] ss:$16 sps:$4 sm:$0xff]  }
 0x428   :  { %v1108_v22 = vpop.f32.mrf.mxu0  ;;  %v1149_v23 = vpop.f32.mrf.mxu1  ;;  %v2989_v18 = vld [vmem:[#allocation11 + $0xc8] ss:$16 sps:$4 sm:$0xff]   ;;  %v2992_v19 = vld [vmem:[#allocation11 + $0xa4] ss:$16 sps:$4 sm:$0xff]   ;;  %v2995_v20 = vld [vmem:[#allocation11 + $0xac] ss:$16 sps:$4 sm:$0xff]  }
 0x429   :  { %2256 = vpow2.f32 %v2115_v21  ;;  %v2998_v21 = vld [vmem:[#allocation11 + $0xa0] ss:$16 sps:$4 sm:$0xff]   ;;  %v3001_v22 = vld [vmem:[#allocation11 + $0xa8] ss:$16 sps:$4 sm:$0xff]   ;;  %v3004_v23 = vld [vmem:[#allocation11 + $0x84] ss:$16 sps:$4 sm:$0xff]  }
 0x42a   :  { %2258 = vtanh.f32 %v1153_v27  ;;  %v2962_v61 = vpop.f32.mrf.mxu0  ;;  %v2964_v0 = vpop.f32.mrf.mxu1  ;;  %v3007_v24 = vld [vmem:[#allocation11 + $0x8c] ss:$16 sps:$4 sm:$0xff]   ;;  %v3010_v25 = vld [vmem:[#allocation11 + $0x80] ss:$16 sps:$4 sm:$0xff]   ;;  %v3016_v27 = vld [vmem:[#allocation11 + $0x64] ss:$16 sps:$4 sm:$0xff]  }
 0x42b   :  { %2260 = vpow2.f32 %v2116_v28  ;;  %v3019_v28 = vld [vmem:[#allocation11 + $0x6c] ss:$16 sps:$4 sm:$0xff]  }
 0x42c   :  { %v2966_v46 = vpop.f32.mrf.mxu0  ;;  %v2968_v39 = vpop.f32.mrf.mxu1 }
 0x42e   :  { %v1235_v47 = vpop.f32.mrf.mxu0  ;;  %v1276_v6 = vpop.f32.mrf.mxu1 }
 0x430   :  { %v1236_v10 = vpop.f32.mrf.mxu0  ;;  %v1277_v11 = vpop.f32.mrf.mxu1 }
 0x434   :  { %v2255_v29 = vpop.eup %2254 }
 0x435   :  { %v1158_v30 = vadd.f32 1.0, %v2255_v29  ;;  %v3022_v29 = vld [vmem:[#allocation11 + $0x60] ss:$16 sps:$4 sm:$0xff]  }
 0x436   :  { %v2257_v31 = vpop.eup %2256 }
 0x437   :  { %2262 = vrcp.f32 %v1158_v30  ;;  %v1164_v32 = vadd.f32 1.0, %v2257_v31  ;;  %v2259_v48 = vpop.eup %2258  ;;  %v3025_v30 = vld [vmem:[#allocation11 + $0x68] ss:$16 sps:$4 sm:$0xff]   ;;  %v3028_v31 = vld [vmem:[#allocation11 + $0x44] ss:$16 sps:$4 sm:$0xff]  }
 0x438   :  { %v2261_v53 = vpop.eup %2260 }
 0x439   :  { %2264 = vrcp.f32 %v1164_v32  ;;  %v1171_v52 = vadd.f32 1.0, %v2261_v53  ;;  %v3031_v32 = vld [vmem:[#allocation11 + $0x4c] ss:$16 sps:$4 sm:$0xff]   ;;  %v3037_v53 = vld [vmem:[#allocation11 + $0x48] ss:$16 sps:$4 sm:$0xff]  }
 0x43b   :  { %2266 = vrcp.f32 %v1171_v52 }
 0x444   :  { %v2263_v1 = vpop.eup %2262 }
 0x445   :  { %v1175_v54 = vmul.f32 %v2263_v1, %v2259_v48  ;;  %v3034_v48 = vld [vmem:[#allocation11 + $0x40] ss:$16 sps:$4 sm:$0xff]  }
 0x446   :  { %v2265_v33 = vpop.eup %2264 }
 0x447   :  { %v1174_v60 = vmul.f32 %v2265_v33, %v2879_v58 }
 0x448   :  { %v2267_v55 = vpop.eup %2266 }
 0x449   :  { %v1176_v8 = vadd.f32 %v1175_v54, %v1174_v60 }
 0x44b   :  { %2268 = vtanh.f32 %v1176_v8  ;;  %v2941_v51 = vsel %vm1186_vm12, %v1176_v8, %v2879_v58  ;;  %v2952_v58 = vld [vmem:[#allocation9 + $0x8] ss:$16 sps:$4 sm:$0xff]   ;;  %v1275_v8 = vadd.f32 %v2968_v39, %v2749_v56 }
 0x458   :  { %v2269_v45 = vpop.eup %2268 }
 0x459   :  { %v1178_v50 = vmul.f32 %v2269_v45, %v2267_v55  ;;  %v1273_v45 = vadd.f32 %v2964_v0, %v2752_v5 }
 0x45b   :  { %v2944_v3 = vsel %vm1186_vm12, %v1178_v50, %v2882_v49  ;;  %v1189_v4 = vsel %vm1186_vm12, %v1178_v50, 0.0  ;;  %v2956_v49 = vld [vmem:[#allocation11 + $0xe4] ss:$16 sps:$4 sm:$0xff]  }
 0x45c   :  { %1191 = vst [vmem:[#allocation14 + $0x18] sm:$0xff] %v1189_v4  ;;  %v1279_v59 = vpack.c.bf16 %v2944_v3, %v2944_v3 }
 0x45e   :  { %1313 = vmatmul.mubr.bf16.vlgmr.msra.gmra.mxu0 %v1279_v59  ;;  %1354 = vmatmul.mubr.bf16.vlgmr.msra.gmra.mxu1 %v1279_v59 }
 0x45f   :  { %1423 = vmatpush1.bf16.msra.mxu0 %v2948_v44  ;;  %1440 = vmatprep.mubr.bf16.mxu0 %v3209_v36 }
 0x460   :  { %1464 = vmatpush1.bf16.msra.mxu1 %v2952_v58  ;;  %1481 = vmatprep.mubr.bf16.mxu1 %v3209_v36 }
 0x461   :  { %1491 = vmatprep.subr.bf16.mxu0 %v2956_v49  ;;  %1532 = vmatprep.subr.bf16.mxu1 %v2959_v2 }
 0x466   :  { %2122 = vmatmul.mubr.msk.bf16.vlgmr.msra.gmra.mxu0 %vm191_vm0, %v1404_v12  ;;  %2123 = vmatmul.mubr.msk.bf16.vlgmr.msra.gmra.mxu1 %vm191_vm0, %v1404_v12 }
 0x467   :  { %1492 = vmatpush1.bf16.msra.mxu0 %v2972_v13  ;;  %1533 = vmatpush1.bf16.msra.mxu1 %v2975_v14 }
 0x468   :  { %1493 = vmatprep.subr.bf16.mxu0 %v2978_v15  ;;  %1534 = vmatprep.subr.bf16.mxu1 %v2981_v16 }
 0x469   :  { %1523 = vmatprep.mubr.bf16.mxu0 %v3209_v36  ;;  %1564 = vmatprep.mubr.bf16.mxu1 %v3209_v36 }
 0x46b   :  { %1494 = vmatpush1.bf16.msra.mxu0 %v2986_v17  ;;  %1535 = vmatpush1.bf16.msra.mxu1 %v2989_v18 }
 0x46c   :  { %1495 = vmatprep.subr.bf16.mxu0 %v2992_v19  ;;  %1536 = vmatprep.subr.bf16.mxu1 %v2995_v20 }
 0x46f   :  { %1496 = vmatpush1.bf16.msra.mxu0 %v2998_v21  ;;  %1537 = vmatpush1.bf16.msra.mxu1 %v3001_v22 }
 0x470   :  { %1497 = vmatprep.subr.bf16.mxu0 %v3004_v23  ;;  %1538 = vmatprep.subr.bf16.mxu1 %v3007_v24 }
 0x473   :  { %1498 = vmatpush1.bf16.msra.mxu0 %v3010_v25  ;;  %1539 = vmatpush1.bf16.msra.mxu1 %v3013_v26 }
 0x474   :  { %1499 = vmatprep.subr.bf16.mxu0 %v3016_v27  ;;  %1540 = vmatprep.subr.bf16.mxu1 %v3019_v28 }
 0x477   :  { %1500 = vmatpush1.bf16.msra.mxu0 %v3022_v29  ;;  %1541 = vmatpush1.bf16.msra.mxu1 %v3025_v30 }
 0x478   :  { %1501 = vmatprep.subr.bf16.mxu0 %v3028_v31  ;;  %1542 = vmatprep.subr.bf16.mxu1 %v3031_v32 }
 0x47b   :  { %1502 = vmatpush1.bf16.msra.mxu0 %v3034_v48  ;;  %1543 = vmatpush1.bf16.msra.mxu1 %v3037_v53 }
 0x47c   :  { %1503 = vmatprep.subr.bf16.mxu0 %v2661_v34  ;;  %1544 = vmatprep.subr.bf16.mxu1 %v2663_v35  ;;  %v1232_v34 = vadd.f32 %v2962_v61, %v2743_v62 }
 0x47f   :  { %1504 = vmatpush1.bf16.msra.mxu0 %v2670_v37  ;;  %1545 = vmatpush1.bf16.msra.mxu1 %v2672_v38  ;;  %v1234_v37 = vadd.f32 %v2966_v46, %v2745_v63 }
 0x480   :  { %1505 = vmatprep.subr.bf16.mxu0 %v2677_v40  ;;  %1546 = vmatprep.subr.bf16.mxu1 %v2679_v41 }
 0x483   :  { %1506 = vmatpush1.bf16.msra.mxu0 %v2684_v42  ;;  %1547 = vmatpush1.bf16.msra.mxu1 %v2686_v43 }
 0x484   :  { %1633 = vmatprep.subr.bf16.mxu0 %v2928_v7  ;;  %1674 = vmatprep.subr.bf16.mxu1 %v2931_v9 }
 0x51e   :  { %v1314_v35 = vpop.f32.mrf.mxu0  ;;  %v1355_v1 = vpop.f32.mrf.mxu1 }
 0x51f   :  { %v1362_v38 = vadd.f32 %v1314_v35, %v1232_v34  ;;  %v1364_v50 = vadd.f32 %v1355_v1, %v1273_v45  ;;  %v1615_v45 = vld [vmem:[#allocation6 + $0x18] sm:$0xf] }
 0x520   :  { %v1316_v40 = vpop.f32.mrf.mxu0  ;;  %v1357_v54 = vpop.f32.mrf.mxu1 }
 0x521   :  { %v2119_v41 = vmul.f32 -1.442695, %v1362_v38  ;;  %v1363_v33 = vadd.f32 %v1316_v40, %v1234_v37  ;;  %v1365_v55 = vadd.f32 %v1357_v54, %v1275_v8  ;;  %v1396_v37 = vpop.permute.xlu0 %1395 }
 0x522   :  { %v1318_v42 = vpop.f32.mrf.mxu0  ;;  %v1359_v52 = vpop.f32.mrf.mxu1  ;;  %vm1397_vm13 = vcmp.eq.s32.totalorder %v1396_v37, 1 }
 0x523   :  { %2270 = vpow2.f32 %v2119_v41  ;;  %v2120_v43 = vmul.f32 -1.442695, %v1363_v33  ;;  %v2121_v4 = vmul.f32 -1.442695, %v1365_v55 }
 0x524   :  { %v1319_v60 = vpop.f32.mrf.mxu0  ;;  %v1360_v57 = vpop.f32.mrf.mxu1 }
 0x525   :  { %2272 = vpow2.f32 %v2120_v43 }
 0x526   :  { %2274 = vtanh.f32 %v1364_v50  ;;  %v3103_v50 = vld [vmem:[#allocation11 + $0x24] ss:$16 sps:$4 sm:$0xff]  }
 0x527   :  { %2276 = vpow2.f32 %v2121_v4  ;;  %v3106_v4 = vld [vmem:[#allocation11 + $0x2c] ss:$16 sps:$4 sm:$0xff]  }
 0x530   :  { %v2271_v59 = vpop.eup %2270 }
 0x531   :  { %v1369_v61 = vadd.f32 1.0, %v2271_v59  ;;  %v3109_v59 = vld [vmem:[#allocation11 + $0x20] ss:$16 sps:$4 sm:$0xff]  }
 0x532   :  { %v2273_v46 = vpop.eup %2272 }
 0x533   :  { %2278 = vrcp.f32 %v1369_v61  ;;  %v1375_v47 = vadd.f32 1.0, %v2273_v46  ;;  %v2275_v6 = vpop.eup %2274  ;;  %v3112_v61 = vld [vmem:[#allocation11 + $0x28] ss:$16 sps:$4 sm:$0xff]   ;;  %v3115_v46 = vld [vmem:[#allocation11 + $0x4] ss:$16 sps:$4 sm:$0xff]  }
 0x534   :  { %v2277_v10 = vpop.eup %2276 }
 0x535   :  { %2280 = vrcp.f32 %v1375_v47  ;;  %v1382_v39 = vadd.f32 1.0, %v2277_v10  ;;  %v3118_v47 = vld [vmem:[#allocation11 + $0xc] ss:$16 sps:$4 sm:$0xff]   ;;  %v3124_v10 = vld [vmem:[#allocation11 + $0x8] ss:$16 sps:$4 sm:$0xff]  }
 0x537   :  { %2282 = vrcp.f32 %v1382_v39 }
 0x540   :  { %v2279_v11 = vpop.eup %2278 }
 0x541   :  { %v1386_v12 = vmul.f32 %v2279_v11, %v2275_v6  ;;  %v3121_v6 = vld [vmem:[#allocation11] ss:$16 sps:$4 sm:$0xff]  }
 0x542   :  { %v2281_v34 = vpop.eup %2280 }
 0x543   :  { %v1385_v35 = vmul.f32 %v2281_v34, %v2941_v51 }
 0x544   :  { %v2283_v38 = vpop.eup %2282 }
 0x545   :  { %v1387_v0 = vadd.f32 %v1386_v12, %v1385_v35 }
 0x547   :  { %2284 = vtanh.f32 %v1387_v0  ;;  %v3060_v1 = vsel %vm1397_vm13, %v1387_v0, %v2941_v51  ;;  %v1442_v51 = vpop.f32.mrf.mxu0 }
 0x548   :  { %v1443_v11 = vadd.f32 %v1442_v51, %v2743_v62 }
 0x549   :  { %v1444_v52 = vpop.f32.mrf.mxu0 }
 0x54a   :  { %v1445_v39 = vadd.f32 %v1444_v52, %v2745_v63 }
 0x54b   :  { %v1446_v60 = vpop.f32.mrf.mxu0 }
 0x54d   :  { %v1447_v8 = vpop.f32.mrf.mxu0 }
 0x554   :  { %v2285_v40 = vpop.eup %2284 }
 0x555   :  { %v1389_v54 = vmul.f32 %v2285_v40, %v2283_v38 }
 0x557   :  { %v3063_v41 = vsel %vm1397_vm13, %v1389_v54, %v2944_v3  ;;  %v1400_v33 = vsel %vm1397_vm13, %v1389_v54, 0.0  ;;  %v3073_v3 = vpop.f32.mrf.mxu1 }
 0x558   :  { %1402 = vst [vmem:[#allocation14 + $0x20] sm:$0xff] %v1400_v33  ;;  %v1490_v42 = vpack.c.bf16 %v3063_v41, %v3063_v41  ;;  %v1484_v51 = vadd.f32 %v3073_v3, %v2752_v5 }
 0x559   :  { %v3075_v43 = vpop.f32.mrf.mxu1 }
 0x55a   :  { %1524 = vmatmul.mubr.bf16.vlgmr.msra.gmra.mxu0 %v1490_v42  ;;  %1565 = vmatmul.mubr.bf16.vlgmr.msra.gmra.mxu1 %v1490_v42 }
 0x55b   :  { %1634 = vmatpush1.bf16.msra.mxu0 %v2948_v44  ;;  %1651 = vmatprep.mubr.bf16.mxu0 %v3209_v36  ;;  %v1487_v57 = vpop.f32.mrf.mxu1 }
 0x55c   :  { %1675 = vmatpush1.bf16.msra.mxu1 %v2952_v58  ;;  %1692 = vmatprep.mubr.bf16.mxu1 %v3209_v36 }
 0x55d   :  { %1702 = vmatprep.subr.bf16.mxu0 %v2956_v49  ;;  %1743 = vmatprep.subr.bf16.mxu1 %v2959_v2  ;;  %v1488_v55 = vpop.f32.mrf.mxu1 }
 0x562   :  { %2127 = vmatmul.mubr.msk.bf16.vlgmr.msra.gmra.mxu0 %vm191_vm0, %v1615_v45  ;;  %2128 = vmatmul.mubr.msk.bf16.vlgmr.msra.gmra.mxu1 %vm191_vm0, %v1615_v45 }
 0x563   :  { %1703 = vmatpush1.bf16.msra.mxu0 %v2972_v13  ;;  %1744 = vmatpush1.bf16.msra.mxu1 %v2975_v14 }
 0x564   :  { %1704 = vmatprep.subr.bf16.mxu0 %v2978_v15  ;;  %1745 = vmatprep.subr.bf16.mxu1 %v2981_v16 }
 0x565   :  { %1734 = vmatprep.mubr.bf16.mxu0 %v3209_v36  ;;  %1775 = vmatprep.mubr.bf16.mxu1 %v3209_v36 }
 0x567   :  { %1705 = vmatpush1.bf16.msra.mxu0 %v2986_v17  ;;  %1746 = vmatpush1.bf16.msra.mxu1 %v2989_v18 }
 0x568   :  { %1706 = vmatprep.subr.bf16.mxu0 %v2992_v19  ;;  %1747 = vmatprep.subr.bf16.mxu1 %v2995_v20 }
 0x56b   :  { %1707 = vmatpush1.bf16.msra.mxu0 %v2998_v21  ;;  %1748 = vmatpush1.bf16.msra.mxu1 %v3001_v22 }
 0x56c   :  { %1708 = vmatprep.subr.bf16.mxu0 %v3004_v23  ;;  %1749 = vmatprep.subr.bf16.mxu1 %v3007_v24 }
 0x56f   :  { %1709 = vmatpush1.bf16.msra.mxu0 %v3010_v25  ;;  %1750 = vmatpush1.bf16.msra.mxu1 %v3013_v26 }
 0x570   :  { %1710 = vmatprep.subr.bf16.mxu0 %v3016_v27  ;;  %1751 = vmatprep.subr.bf16.mxu1 %v3019_v28 }
 0x573   :  { %1711 = vmatpush1.bf16.msra.mxu0 %v3022_v29  ;;  %1752 = vmatpush1.bf16.msra.mxu1 %v3025_v30 }
 0x574   :  { %1712 = vmatprep.subr.bf16.mxu0 %v3028_v31  ;;  %1753 = vmatprep.subr.bf16.mxu1 %v3031_v32 }
 0x577   :  { %1713 = vmatpush1.bf16.msra.mxu0 %v3034_v48  ;;  %1754 = vmatpush1.bf16.msra.mxu1 %v3037_v53 }
 0x578   :  { %1714 = vmatprep.subr.bf16.mxu0 %v3103_v50  ;;  %1755 = vmatprep.subr.bf16.mxu1 %v3106_v4 }
 0x57b   :  { %1715 = vmatpush1.bf16.msra.mxu0 %v3109_v59  ;;  %1756 = vmatpush1.bf16.msra.mxu1 %v3112_v61 }
 0x57c   :  { %1716 = vmatprep.subr.bf16.mxu0 %v3115_v46  ;;  %1757 = vmatprep.subr.bf16.mxu1 %v3118_v47 }
 0x57f   :  { %1717 = vmatpush1.bf16.msra.mxu0 %v3121_v6  ;;  %1758 = vmatpush1.bf16.msra.mxu1 %v3124_v10 }
 0x580   :  { %1844 = vmatprep.subr.bf16.mxu0 %v2928_v7  ;;  %1885 = vmatprep.subr.bf16.mxu1 %v2931_v9  ;;  %v1486_v7 = vadd.f32 %v3075_v43, %v2749_v56 }
 0x61a   :  { %v1525_v12 = vpop.f32.mrf.mxu0  ;;  %v1566_v34 = vpop.f32.mrf.mxu1 }
 0x61b   :  { %v1573_v35 = vadd.f32 %v1525_v12, %v1443_v11  ;;  %v1575_v52 = vadd.f32 %v1566_v34, %v1484_v51 }
 0x61c   :  { %v1527_v37 = vpop.f32.mrf.mxu0  ;;  %v1568_v0 = vpop.f32.mrf.mxu1 }
 0x61d   :  { %v2124_v38 = vmul.f32 -1.442695, %v1573_v35  ;;  %v1574_v40 = vadd.f32 %v1527_v37, %v1445_v39  ;;  %v1576_v9 = vadd.f32 %v1568_v0, %v1486_v7 }
 0x61e   :  { %v1529_v54 = vpop.f32.mrf.mxu0  ;;  %v1570_v33 = vpop.f32.mrf.mxu1 }
 0x61f   :  { %2286 = vpow2.f32 %v2124_v38  ;;  %v2125_v42 = vmul.f32 -1.442695, %v1574_v40  ;;  %v2126_v8 = vmul.f32 -1.442695, %v1576_v9  ;;  %v1607_v54 = vpop.permute.xlu1 %1606 }
 0x620   :  { %v1530_v60 = vpop.f32.mrf.mxu0  ;;  %v1571_v57 = vpop.f32.mrf.mxu1  ;;  %vm1608_vm14 = vcmp.eq.s32.totalorder %v1607_v54, 1 }
 0x621   :  { %2288 = vpow2.f32 %v2125_v42 }
 0x622   :  { %2290 = vtanh.f32 %v1575_v52 }
 0x623   :  { %2292 = vpow2.f32 %v2126_v8 }
 0x62c   :  { %v2287_v55 = vpop.eup %2286 }
 0x62d   :  { %v1580_v45 = vadd.f32 1.0, %v2287_v55 }
 0x62e   :  { %v2289_v11 = vpop.eup %2288 }
 0x62f   :  { %2294 = vrcp.f32 %v1580_v45  ;;  %v1586_v12 = vadd.f32 1.0, %v2289_v11  ;;  %v2291_v39 = vpop.eup %2290 }
 0x630   :  { %v2293_v35 = vpop.eup %2292 }
 0x631   :  { %2296 = vrcp.f32 %v1586_v12  ;;  %v1593_v43 = vadd.f32 1.0, %v2293_v35  ;;  %v1826_v12 = vld [vmem:[#allocation6 + $0x1c] sm:$0xf] }
 0x633   :  { %2298 = vrcp.f32 %v1593_v43 }
 0x63c   :  { %v2295_v37 = vpop.eup %2294 }
 0x63d   :  { %v1597_v38 = vmul.f32 %v2295_v37, %v2291_v39 }
 0x63e   :  { %v2297_v40 = vpop.eup %2296 }
 0x63f   :  { %v1596_v0 = vmul.f32 %v2297_v40, %v3060_v1 }
 0x640   :  { %v2299_v33 = vpop.eup %2298 }
 0x641   :  { %v1598_v3 = vadd.f32 %v1597_v38, %v1596_v0 }
 0x643   :  { %2300 = vtanh.f32 %v1598_v3  ;;  %v3137_v34 = vsel %vm1608_vm14, %v1598_v3, %v3060_v1  ;;  %v1653_v1 = vpop.f32.mrf.mxu0 }
 0x645   :  { %v1655_v51 = vpop.f32.mrf.mxu0 }
 0x647   :  { %v1657_v8 = vpop.f32.mrf.mxu0 }
 0x649   :  { %v1658_v45 = vpop.f32.mrf.mxu0 }
 0x650   :  { %v2301_v42 = vpop.eup %2300 }
 0x651   :  { %v1600_v60 = vmul.f32 %v2301_v42, %v2299_v33 }
 0x653   :  { %v3140_v57 = vsel %vm1608_vm14, %v1600_v60, %v3063_v41  ;;  %v1611_v7 = vsel %vm1608_vm14, %v1600_v60, 0.0  ;;  %v1694_v41 = vpop.f32.mrf.mxu1 }
 0x654   :  { %1613 = vst [vmem:[#allocation14 + $0x28] sm:$0xff] %v1611_v7  ;;  %v1701_v9 = vpack.c.bf16 %v3140_v57, %v3140_v57 }
 0x655   :  { %v1696_v52 = vpop.f32.mrf.mxu1 }
 0x656   :  { %1735 = vmatmul.mubr.bf16.vlgmr.msra.gmra.mxu0 %v1701_v9  ;;  %1776 = vmatmul.mubr.bf16.vlgmr.msra.gmra.mxu1 %v1701_v9 }
 0x657   :  { %1845 = vmatpush1.bf16.msra.mxu0 %v2948_v44  ;;  %1862 = vmatprep.mubr.bf16.mxu0 %v3209_v36  ;;  %v1698_v55 = vpop.f32.mrf.mxu1 }
 0x658   :  { %1886 = vmatpush1.bf16.msra.mxu1 %v2952_v58  ;;  %1903 = vmatprep.mubr.bf16.mxu1 %v3209_v36 }
 0x659   :  { %1913 = vmatprep.subr.bf16.mxu0 %v2956_v49  ;;  %1954 = vmatprep.subr.bf16.mxu1 %v2959_v2  ;;  %v1699_v11 = vpop.f32.mrf.mxu1  ;;  %v1656_v49 = vadd.f32 %v1655_v51, %v2745_v63 }
 0x65e   :  { %2132 = vmatmul.mubr.msk.bf16.vlgmr.msra.gmra.mxu0 %vm191_vm0, %v1826_v12  ;;  %2133 = vmatmul.mubr.msk.bf16.vlgmr.msra.gmra.mxu1 %vm191_vm0, %v1826_v12 }
 0x65f   :  { %1914 = vmatpush1.bf16.msra.mxu0 %v2972_v13  ;;  %1955 = vmatpush1.bf16.msra.mxu1 %v2975_v14 }
 0x660   :  { %1915 = vmatprep.subr.bf16.mxu0 %v2978_v15  ;;  %1956 = vmatprep.subr.bf16.mxu1 %v2981_v16 }
 0x661   :  { %1945 = vmatprep.mubr.bf16.mxu0 %v3209_v36  ;;  %1986 = vmatprep.mubr.bf16.mxu1 %v3209_v36  ;;  %v1654_v36 = vadd.f32 %v1653_v1, %v2743_v62 }
 0x663   :  { %1916 = vmatpush1.bf16.msra.mxu0 %v2986_v17  ;;  %1957 = vmatpush1.bf16.msra.mxu1 %v2989_v18 }
 0x664   :  { %1917 = vmatprep.subr.bf16.mxu0 %v2992_v19  ;;  %1958 = vmatprep.subr.bf16.mxu1 %v2995_v20 }
 0x667   :  { %1918 = vmatpush1.bf16.msra.mxu0 %v2998_v21  ;;  %1959 = vmatpush1.bf16.msra.mxu1 %v3001_v22  ;;  %v1697_v22 = vadd.f32 %v1696_v52, %v2749_v56 }
 0x668   :  { %1919 = vmatprep.subr.bf16.mxu0 %v3004_v23  ;;  %1960 = vmatprep.subr.bf16.mxu1 %v3007_v24  ;;  %v1695_v24 = vadd.f32 %v1694_v41, %v2752_v5 }
 0x66b   :  { %1920 = vmatpush1.bf16.msra.mxu0 %v3010_v25  ;;  %1961 = vmatpush1.bf16.msra.mxu1 %v3013_v26 }
 0x66c   :  { %1921 = vmatprep.subr.bf16.mxu0 %v3016_v27  ;;  %1962 = vmatprep.subr.bf16.mxu1 %v3019_v28 }
 0x66f   :  { %1922 = vmatpush1.bf16.msra.mxu0 %v3022_v29  ;;  %1963 = vmatpush1.bf16.msra.mxu1 %v3025_v30 }
 0x670   :  { %1923 = vmatprep.subr.bf16.mxu0 %v3028_v31  ;;  %1964 = vmatprep.subr.bf16.mxu1 %v3031_v32 }
 0x673   :  { %1924 = vmatpush1.bf16.msra.mxu0 %v3034_v48  ;;  %1965 = vmatpush1.bf16.msra.mxu1 %v3037_v53 }
 0x674   :  { %1925 = vmatprep.subr.bf16.mxu0 %v3103_v50  ;;  %1966 = vmatprep.subr.bf16.mxu1 %v3106_v4 }
 0x677   :  { %1926 = vmatpush1.bf16.msra.mxu0 %v3109_v59  ;;  %1967 = vmatpush1.bf16.msra.mxu1 %v3112_v61  ;;  %v1818_v59 = vpop.permute.xlu0 %1817 }
 0x678   :  { %1927 = vmatprep.subr.bf16.mxu0 %v3115_v46  ;;  %1968 = vmatprep.subr.bf16.mxu1 %v3118_v47  ;;  %vm1819_vm15 = vcmp.eq.s32.totalorder %v1818_v59, 1 }
 0x67b   :  { %1928 = vmatpush1.bf16.msra.mxu0 %v3121_v6  ;;  %1969 = vmatpush1.bf16.msra.mxu1 %v3124_v10 }
 0x716   :  { %v1736_v44 = vpop.f32.mrf.mxu0  ;;  %v1777_v58 = vpop.f32.mrf.mxu1 }
 0x717   :  { %v1784_v2 = vadd.f32 %v1736_v44, %v1654_v36  ;;  %v1786_v25 = vadd.f32 %v1777_v58, %v1695_v24 }
 0x718   :  { %v1738_v13 = vpop.f32.mrf.mxu0  ;;  %v1779_v14 = vpop.f32.mrf.mxu1 }
 0x719   :  { %v2129_v15 = vmul.f32 -1.442695, %v1784_v2  ;;  %v1785_v16 = vadd.f32 %v1738_v13, %v1656_v49  ;;  %v1787_v23 = vadd.f32 %v1779_v14, %v1697_v22 }
 0x71a   :  { %v1740_v17 = vpop.f32.mrf.mxu0  ;;  %v1781_v18 = vpop.f32.mrf.mxu1 }
 0x71b   :  { %2302 = vpow2.f32 %v2129_v15  ;;  %v2130_v19 = vmul.f32 -1.442695, %v1785_v16  ;;  %v2131_v26 = vmul.f32 -1.442695, %v1787_v23 }
 0x71c   :  { %v1741_v20 = vpop.f32.mrf.mxu0  ;;  %v1782_v21 = vpop.f32.mrf.mxu1 }
 0x71d   :  { %2304 = vpow2.f32 %v2130_v19 }
 0x71e   :  { %2306 = vtanh.f32 %v1786_v25  ;;  %v1864_v40 = vpop.f32.mrf.mxu0  ;;  %v1905_v43 = vpop.f32.mrf.mxu1 }
 0x71f   :  { %2308 = vpow2.f32 %v2131_v26 }
 0x720   :  { %v1866_v0 = vpop.f32.mrf.mxu0  ;;  %v1907_v54 = vpop.f32.mrf.mxu1 }
 0x721   :  { %v1867_v1 = vadd.f32 %v1866_v0, %v2745_v63  ;;  %v1908_v44 = vadd.f32 %v1907_v54, %v2749_v56  ;;  %v2029_v56 = vpop.permute.xlu1 %2028 }
 0x722   :  { %v1868_v3 = vpop.f32.mrf.mxu0  ;;  %v1909_v33 = vpop.f32.mrf.mxu1  ;;  %vm2030_vm0 = vcmp.eq.s32.totalorder %v2029_v56, 1 }
 0x724   :  { %v1869_v42 = vpop.f32.mrf.mxu0  ;;  %v1910_v60 = vpop.f32.mrf.mxu1 }
 0x728   :  { %v2303_v27 = vpop.eup %2302 }
 0x729   :  { %v1791_v28 = vadd.f32 1.0, %v2303_v27 }
 0x72a   :  { %v2305_v29 = vpop.eup %2304 }
 0x72b   :  { %2310 = vrcp.f32 %v1791_v28  ;;  %v1797_v30 = vadd.f32 1.0, %v2305_v29  ;;  %v2307_v31 = vpop.eup %2306 }
 0x72c   :  { %v2309_v32 = vpop.eup %2308 }
 0x72d   :  { %2312 = vrcp.f32 %v1797_v30  ;;  %v1804_v4 = vadd.f32 1.0, %v2309_v32 }
 0x72f   :  { %2314 = vrcp.f32 %v1804_v4 }
 0x738   :  { %v2311_v48 = vpop.eup %2310 }
 0x739   :  { %v1808_v53 = vmul.f32 %v2311_v48, %v2307_v31 }
 0x73a   :  { %v2313_v50 = vpop.eup %2312 }
 0x73b   :  { %v1807_v61 = vmul.f32 %v2313_v50, %v3137_v34 }
 0x73c   :  { %v2315_v6 = vpop.eup %2314 }
 0x73d   :  { %v1809_v46 = vadd.f32 %v1808_v53, %v1807_v61 }
 0x73f   :  { %2316 = vtanh.f32 %v1809_v46  ;;  %v1821_v47 = vsel %vm1819_vm15, %v1809_v46, %v3137_v34  ;;  %v1865_v34 = vadd.f32 %v1864_v40, %v2743_v62  ;;  %v1906_v62 = vadd.f32 %v1905_v43, %v2752_v5 }
 0x74c   :  { %v2317_v10 = vpop.eup %2316 }
 0x74d   :  { %v1811_v39 = vmul.f32 %v2317_v10, %v2315_v6 }
 0x74f   :  { %v1820_v35 = vsel %vm1819_vm15, %v1811_v39, %v3140_v57  ;;  %v1822_v37 = vsel %vm1819_vm15, %v1811_v39, 0.0 }
 0x750   :  { %1824 = vst [vmem:[#allocation14 + $0x30] sm:$0xff] %v1822_v37  ;;  %v1912_v38 = vpack.c.bf16 %v1820_v35, %v1820_v35 }
 0x752   :  { %1946 = vmatmul.mubr.bf16.vlgmr.msra.gmra.mxu0 %v1912_v38  ;;  %1987 = vmatmul.mubr.bf16.vlgmr.msra.gmra.mxu1 %v1912_v38 }
 0x812   :  { %v1947_v7 = vpop.f32.mrf.mxu0  ;;  %v1988_v9 = vpop.f32.mrf.mxu1 }
 0x813   :  { %v1995_v57 = vadd.f32 %v1947_v7, %v1865_v34  ;;  %v1997_v49 = vadd.f32 %v1988_v9, %v1906_v62 }
 0x814   :  { %v1949_v41 = vpop.f32.mrf.mxu0  ;;  %v1990_v51 = vpop.f32.mrf.mxu1 }
 0x815   :  { %v2134_v52 = vmul.f32 -1.442695, %v1995_v57  ;;  %v1996_v8 = vadd.f32 %v1949_v41, %v1867_v1  ;;  %v1998_v58 = vadd.f32 %v1990_v51, %v1908_v44 }
 0x816   :  { %v1951_v55 = vpop.f32.mrf.mxu0  ;;  %v1992_v45 = vpop.f32.mrf.mxu1 }
 0x817   :  { %2318 = vpow2.f32 %v2134_v52  ;;  %v2135_v11 = vmul.f32 -1.442695, %v1996_v8  ;;  %v2136_v2 = vmul.f32 -1.442695, %v1998_v58 }
 0x818   :  { %v1952_v12 = vpop.f32.mrf.mxu0  ;;  %v1993_v36 = vpop.f32.mrf.mxu1 }
 0x819   :  { %2320 = vpow2.f32 %v2135_v11 }
 0x81a   :  { %2322 = vtanh.f32 %v1997_v49 }
 0x81b   :  { %2324 = vpow2.f32 %v2136_v2 }
 0x824   :  { %v2319_v63 = vpop.eup %2318 }
 0x825   :  { %v2002_v13 = vadd.f32 1.0, %v2319_v63 }
 0x826   :  { %v2321_v14 = vpop.eup %2320 }
 0x827   :  { %2326 = vrcp.f32 %v2002_v13  ;;  %v2008_v15 = vadd.f32 1.0, %v2321_v14  ;;  %v2323_v16 = vpop.eup %2322 }
 0x828   :  { %v2325_v17 = vpop.eup %2324 }
 0x829   :  { %2328 = vrcp.f32 %v2008_v15  ;;  %v2015_v21 = vadd.f32 1.0, %v2325_v17 }
 0x82b   :  { %2330 = vrcp.f32 %v2015_v21 }
 0x834   :  { %v2327_v18 = vpop.eup %2326 }
 0x835   :  { %v2019_v19 = vmul.f32 %v2327_v18, %v2323_v16 }
 0x836   :  { %v2329_v20 = vpop.eup %2328 }
 0x837   :  { %v2018_v22 = vmul.f32 %v2329_v20, %v1821_v47 }
 0x838   :  { %v2331_v24 = vpop.eup %2330 }
 0x839   :  { %v2020_v23 = vadd.f32 %v2019_v19, %v2018_v22 }
 0x83b   :  { %2332 = vtanh.f32 %v2020_v23  ;;  %v2032_v5 = vsel %vm2030_vm0, %v2020_v23, %v1821_v47 }
 0x83c   :  { %2037 = vst [vmem:[#allocation3] sm:$0xff] %v2032_v5 }
 0x848   :  { %v2333_v25 = vpop.eup %2332 }
 0x849   :  { %v2022_v26 = vmul.f32 %v2333_v25, %v2331_v24 }
 0x84b   :  { %v2031_v27 = vsel %vm2030_vm0, %v2022_v26, %v1820_v35  ;;  %v2033_v28 = vsel %vm2030_vm0, %v2022_v26, 0.0 }
 0x84c   :  { %2035 = vst [vmem:[#allocation14 + $0x38] sm:$0xff] %v2033_v28  ;;  %2036 = vst [vmem:[#allocation2] sm:$0xff] %v2031_v27 }
 0x84d PF:  { %s2488_s1 = smov [#allocation14]  }
 0x84e   :  { %s2043_s10 = sshll.u32 %s2488_s1, 4  ;;  %s2044_s10 = int_to_ptr.vmem [resolvable:$true] %s2043_s10 }
 0x84f   :  { %s2450_s11 = scalar_lea.vmem %s2044_s10, 1024  ;;  %p2455_p9 = scmp.lt.s32.totalorder %s2044_s10, %s2044_s10 }
 0x850   :  { %p2451_p8 = scmp.ne.s32.totalorder %s2044_s10, %s2450_s11  ;;  %p2456_p10 = scmp.lt.s32.totalorder %s2450_s11, %s2450_s11 }
 0x852   :  { %p2457_p11 = por %p2456_p10, %p2455_p9 }
 0x854   :  { %p2458_p12 = pnand %p2457_p11, %p2451_p8 }
 0x856   :  { %2461 = shalt.err (!%p2458_p12)
}
 0x857   :  { %s2489_s12 = smov 128   ;;  %s2490_s13 = smov 8  }
 0x858   :  { %2049 = dma.vmem_to_hbm [thread:$0]  %s2044_s10, 1024, %s3206_s8, [#allocation8], %s2489_s12, %s2489_s12, %s2490_s13  }
 0x859   :  { %2476 = dma.done.wait [#allocation8], 1024  }
 0x85a   :  { %2477 = vsyncadd [#allocation8], 4294966272 }
 0x85b   :  { %2053 = vsyncpa [#allocation7], 1 }
 0x85c   :  { %2054 = vsyncpa [#allocation10], 1 }
 0x85d   :  { %2055 = vsyncpa [#allocation13], 1 }
 0x85e   :  { %2056 = vsyncpa [#allocation8], 1 }

</bundles_post_ra>
